<compile_context>
chip_gen: v6e
topology: v6e:2x2x1
jax: 0.10.0
libtpu: 0.0.40
codegen_flags: <defaults>
</compile_context>

<pallas_src>
import functools

import jax
import jax.numpy as jnp
from jax.experimental import pallas as pl
from jax.experimental.pallas import tpu as pltpu

_BN_EPS = 1e-3           # module explicitly uses eps=0.001


def _round_up(x, m):
    return (x + m - 1) // m * m


def _compiler_params():
    return pltpu.CompilerParams(
        dimension_semantics=("parallel",),
        vmem_limit_bytes=32 * 1024 * 1024,
    )


def _fold_bn(p):
    scale = p['gamma'] / jnp.sqrt(p['var'] + _BN_EPS)
    shift = p['beta'] - p['mean'] * scale
    return scale, shift


def _im2col(x, k, stride):
    # x: (B, L_pad, C) -> patches (B, L_out, k*C); patch index = dk*C + ci.
    B, Lp, C = x.shape
    L_out = (Lp - k) // stride + 1
    cols = [x[:, dk:dk + (L_out - 1) * stride + 1:stride, :] for dk in range(k)]
    patches = jnp.stack(cols, axis=2)          # (B, L_out, k, C)
    return patches.reshape(B, L_out, k * C), L_out


# ----------------------- kernel 1: conv1 + BN + ReLU + pool8 -----------------

def _conv1_pool_kernel(p_ref, m_ref, w_ref, s_ref, o_ref, *, pool):
    # p_ref: (TW*pool, K) bf16 im2col patches (zero rows where the pool padding
    #        sits), m_ref: (TW*pool, 1) f32 validity mask, w_ref: (K, C) bf16
    #        weights with BN scale folded in, s_ref: (1, C) f32 BN shift,
    #        o_ref: (TW, C) bf16 pooled output.
    acc = jnp.dot(p_ref[...], w_ref[...], preferred_element_type=jnp.float32)
    y = jnp.maximum(acc + s_ref[...], 0.0) * m_ref[...]   # pad rows -> exactly 0
    tw, C = o_ref.shape
    y3 = y.reshape(tw, pool, C)
    r = y3[:, 0, :]
    for j in range(1, pool):
        r = jnp.maximum(r, y3[:, j, :])
    o_ref[...] = r.astype(o_ref.dtype)


def conv1_pool_block(x, p, k, stride, conv_pad, pool, pool_pad):
    # ConstantPad1d -> Conv1d(bias=False) -> BN(eval) -> ReLU -> ConstantPad1d
    # -> MaxPool1d(pool, pool), all in one tiled bf16 matmul kernel.
    B, _, Cin = x.shape
    xp = jnp.pad(x, ((0, 0), (conv_pad[0], conv_pad[1]), (0, 0)))
    patches, L_out = _im2col(xp, k, stride)             # (B, L_out, K)
    K = k * Cin
    w = p['w']                                          # PyTorch (Cout, Cin, k)
    Cout = w.shape[0]
    scale, shift = _fold_bn(p)
    w_mat = (jnp.transpose(w, (2, 1, 0)).reshape(K, Cout)
             * scale[None, :]).astype(jnp.bfloat16)
    shift = shift.reshape(1, Cout).astype(jnp.float32)

    # Pool geometry (floor mode, like PyTorch MaxPool1d ceil_mode=False).
    n1 = (L_out + pool_pad[0] + pool_pad[1]) // pool
    target = n1 * pool
    right = max(0, target - pool_pad[0] - L_out)
    ext = jnp.pad(patches, ((0, 0), (pool_pad[0], right), (0, 0)))[:, :target, :]
    mask = jnp.pad(jnp.ones((L_out,), jnp.float32),
                   (pool_pad[0], right))[:target]       # 0 on pool-pad rows

    W = B * n1                                          # total pooled rows
    # >= 2 grid steps (keeps both v7x TensorCores busy); sublane-aligned tile.
    tile_w = min(256, _round_up(max(8, -(-W // 2)), 8))
    W_pad = _round_up(W, tile_w)
    M, M_pad = W * pool, W_pad * pool

    patches2d = jnp.pad(ext.reshape(M, K).astype(jnp.bfloat16),
                        ((0, M_pad - M), (0, 0)))
    mask2d = jnp.pad(jnp.broadcast_to(mask[None, :], (B, target)).reshape(M, 1),
                     ((0, M_pad - M), (0, 0)))

    cost = pl.CostEstimate(
        flops=2 * M_pad * K * Cout, transcendentals=0,
        bytes_accessed=(M_pad * K * 2 + M_pad * 4 + K * Cout * 2
                        + Cout * 4 + W_pad * Cout * 2))
    out = pl.pallas_call(
        functools.partial(_conv1_pool_kernel, pool=pool),
        out_shape=jax.ShapeDtypeStruct((W_pad, Cout), jnp.bfloat16),
        grid=(W_pad // tile_w,),
        in_specs=[
            pl.BlockSpec((tile_w * pool, K), lambda i: (i, 0)),
            pl.BlockSpec((tile_w * pool, 1), lambda i: (i, 0)),
            pl.BlockSpec((K, Cout), lambda i: (0, 0)),
            pl.BlockSpec((1, Cout), lambda i: (0, 0)),
        ],
        out_specs=pl.BlockSpec((tile_w, Cout), lambda i: (i, 0)),
        compiler_params=_compiler_params(),
        cost_estimate=cost,
    )(patches2d, mask2d, w_mat, shift)
    return out[:W].reshape(B, n1, Cout)


# --------------- kernel 2: conv2 -> conv3 -> conv4 -> pool4 (fused) ----------

def _fused_convs_pool_kernel(x_ref, w_ref, s_ref, o_ref, slab_ref, patch_ref, *,
                             n_taps, pad_l, n_layers, pool):
    # x_ref: (TB, L, C) bf16, w_ref: (n_layers, k*C, C) bf16 (BN scale folded),
    # s_ref: (n_layers, 1, C) f32 shifts, o_ref: (TB, n2, C) f32 pooled output.
    # slab_ref: (TB, L + k - 1, C) bf16 resident padded activations,
    # patch_ref: (TB*L, k*C) bf16 per-layer im2col patch matrix.
    TB, L, C = x_ref.shape
    n2 = o_ref.shape[1]
    Lp = L + n_taps - 1
    pad_r = Lp - pad_l - L
    # Zero only the halo rows; the interior is fully overwritten below.
    if pad_l:
        slab_ref[:, :pad_l, :] = jnp.zeros((TB, pad_l, C), slab_ref.dtype)
    if pad_r:
        slab_ref[:, pad_l + L:, :] = jnp.zeros((TB, pad_r, C), slab_ref.dtype)
    slab_ref[:, pad_l:pad_l + L, :] = x_ref[...]

    for layer in range(n_layers):
        # Build the (TB*L, k*C) patch matrix once per layer, then one K=k*C
        # MXU matmul (internal accumulation, no per-tap f32 VPU adds).
        for b in range(TB):
            for dk in range(n_taps):
                patch_ref[b * L:(b + 1) * L, dk * C:(dk + 1) * C] = \
                    slab_ref[b, dk:dk + L, :]
        acc = jnp.dot(patch_ref[...], w_ref[layer],
                      preferred_element_type=jnp.float32)      # (TB*L, C)
        y = jnp.maximum(acc + s_ref[layer], 0.0)
        if layer + 1 < n_layers:
            for b in range(TB):                                # pads stay zero
                slab_ref[b, pad_l:pad_l + L, :] = \
                    y[b * L:(b + 1) * L, :].astype(slab_ref.dtype)
        else:
            # Fused ConstantPad1d((0,1), 0) + MaxPool1d(pool, pool): y >= 0 so
            # the zero pad never raises the max; spilled pad rows are dropped.
            y3 = y.reshape(TB, L, C)
            for wdx in range(n2):
                lo = wdx * pool
                hi = min(lo + pool, L)
                r = y3[:, lo, :]
                for j in range(lo + 1, hi):
                    r = jnp.maximum(r, y3[:, j, :])
                o_ref[:, wdx, :] = r.astype(o_ref.dtype)


def fused_convs_pool_block(x, params_list, k, conv_pad, pool, pool_pad):
    assert conv_pad[0] + conv_pad[1] == k - 1   # length-preserving conv blocks
    assert pool_pad[0] == 0                     # module uses max_pool2 pad (0, 1)
    B, L, C = x.shape
    n_layers = len(params_list)
    w_list, s_list = [], []
    for p in params_list:
        scale, shift = _fold_bn(p)
        w_t = jnp.transpose(p['w'], (2, 1, 0)) * scale[None, None, :]  # (k,Cin,Cout)
        w_list.append(w_t.reshape(k * C, C).astype(jnp.bfloat16))
        s_list.append(shift.reshape(1, C).astype(jnp.float32))
    w_all = jnp.stack(w_list, axis=0)           # (n_layers, k*C, C) bf16
    s_all = jnp.stack(s_list, axis=0)           # (n_layers, 1, C) f32

    n2 = (L + pool_pad[0] + pool_pad[1]) // pool
    TB = max(1, min(4, B // 2))                 # >= 2 grid steps when B >= 2
    B_pad = _round_up(B, TB)
    xb = jnp.pad(x, ((0, B_pad - B), (0, 0), (0, 0)))

    cost = pl.CostEstimate(
        flops=2 * B_pad * n_layers * L * (k * C) * C, transcendentals=0,
        bytes_accessed=(B_pad * L * C * 2 + (B_pad // TB) * w_all.size * 2
                        + s_all.size * 4 + B_pad * n2 * C * 4))
    out = pl.pallas_call(
        functools.partial(_fused_convs_pool_kernel, n_taps=k, pad_l=conv_pad[0],
                          n_layers=n_layers, pool=pool),
        out_shape=jax.ShapeDtypeStruct((B_pad, n2, C), jnp.float32),
        grid=(B_pad // TB,),
        in_specs=[
            pl.BlockSpec((TB, L, C), lambda b: (b, 0, 0)),
            pl.BlockSpec((n_layers, k * C, C), lambda b: (0, 0, 0)),
            pl.BlockSpec((n_layers, 1, C), lambda b: (0, 0, 0)),
        ],
        out_specs=pl.BlockSpec((TB, n2, C), lambda b: (b, 0, 0)),
        scratch_shapes=[pltpu.VMEM((TB, L + k - 1, C), jnp.bfloat16),
                        pltpu.VMEM((TB * L, k * C), jnp.bfloat16)],
        compiler_params=_compiler_params(),
        cost_estimate=cost,
    )(xb, w_all, s_all)
    return out[:B]


# ------------------------------- forward pass --------------------------------

def feature_extractor_forward(x_ncw, params, sf):
    # x_ncw: (B, C_in, L), exactly as the PyTorch module receives it.
    x = jnp.transpose(x_ncw, (0, 2, 1))                 # -> (B, L, C_in)
    first_filter_size = int(sf / 2.0)
    first_filter_stride = int(sf / 16.0)
    # conv1 block + pad(2,2) + MaxPool1d(8,8), fused.
    x = conv1_pool_block(x, params['conv1'], first_filter_size,
                         first_filter_stride, (22, 22), 8, (2, 2))
    # Dropout(p=0.5): identity in eval-mode forward.
    # conv2 -> conv3 -> conv4 blocks + pad(0,1) + MaxPool1d(4,4), fused.
    x = fused_convs_pool_block(
        x, [params['conv2'], params['conv3'], params['conv4']], 8, (3, 4), 4, (0, 1))
    # nn.Flatten() on NCW: transpose back so flattened order is channel-major.
    x = jnp.transpose(x, (0, 2, 1))                     # (B, C, L_final)
    return x.reshape(x.shape[0], -1)
    # Final Dropout(p=0.5): identity in eval-mode forward.


# --------------------------- pure-JAX reference ------------------------------

def _reference_forward(x_ncw, params, sf):
    x = jnp.transpose(x_ncw, (0, 2, 1))

    def conv_bn_relu(x, p, k, stride, pad):
        B, _, Cin = x.shape
        xp = jnp.pad(x, ((0, 0), (pad[0], pad[1]), (0, 0)))
        patches, L_out = _im2col(xp, k, stride)
        w_mat = jnp.transpose(p['w'], (2, 1, 0)).reshape(k * Cin, -1)
        y = patches.reshape(B * L_out, k * Cin) @ w_mat
        scale, shift = _fold_bn(p)
        y = y * scale[None, :] + shift[None, :]
        return jnp.maximum(y, 0.0).reshape(B, L_out, -1)

    def pool(x, p, pad):
        xp = jnp.pad(x, ((0, 0), (pad[0], pad[1]), (0, 0)))
        n = xp.shape[1] // p
        return jnp.max(xp[:, :n * p, :].reshape(x.shape[0], n, p, -1), axis=2)

    k1, s1 = int(sf / 2.0), int(sf / 16.0)
    x = conv_bn_relu(x, params['conv1'], k1, s1, (22, 22))
    x = pool(x, 8, (2, 2))
    x = conv_bn_relu(x, params['conv2'], 8, 1, (3, 4))
    x = conv_bn_relu(x, params['conv3'], 8, 1, (3, 4))
    x = conv_bn_relu(x, params['conv4'], 8, 1, (3, 4))
    x = pool(x, 4, (0, 1))
    x = jnp.transpose(x, (0, 2, 1))
    return x.reshape(x.shape[0], -1)


# --------------------------------- setup -------------------------------------

def init_params(key, in_channels, sf):
    first_filter_size = int(sf / 2.0)
    specs = [('conv1', in_channels, first_filter_size),
             ('conv2', 128, 8), ('conv3', 128, 8), ('conv4', 128, 8)]
    params = {}
    for name, cin, k in specs:
        key, k1, k2, k3, k4, k5 = jax.random.split(key, 6)
        params[name] = {
            'w': 0.05 * jax.random.normal(k1, (128, cin, k), jnp.float32),
            'gamma': jax.random.uniform(k2, (128,), jnp.float32, 0.8, 1.2),
            'beta': 0.1 * jax.random.normal(k3, (128,), jnp.float32),
            'mean': 0.1 * jax.random.normal(k4, (128,), jnp.float32),
            'var': jax.random.uniform(k5, (128,), jnp.float32, 0.5, 1.5),
        }
    return params


if __name__ == "__main__":
    # Small deterministic config consistent with the module:
    #   sf=32 -> first conv kernel=16, stride=2; in_channels=1; input length 128.
    SF = 32
    IN_CHANNELS = 1
    B, L = 2, 128

    key = jax.random.PRNGKey(0)
    kx, kp = jax.random.split(key)
    x = jax.random.normal(kx, (B, IN_CHANNELS, L), jnp.float32)   # PyTorch NCW input
    params = init_params(kp, IN_CHANNELS, SF)

    fwd = jax.jit(feature_extractor_forward, static_argnums=2)
    out = jax.block_until_ready(fwd(x, params, SF))
    assert out.shape == (B, 128 * 2), out.shape       # (B, C_out * L_final) = (2, 256)

    # Numerical sanity vs. pure-JAX f32 reference (kernels use bf16 MXU operands).
    ref = jax.block_until_ready(_reference_forward(x, params, SF))
    max_err = float(jnp.max(jnp.abs(out - ref)))
    bound = 0.05 * float(jnp.max(jnp.abs(ref))) + 0.05
    assert max_err <= bound, (max_err, bound)

    print("KERNEL_OK")
</pallas_src>

<mosaic_0001>
module attributes {stable_mosaic.version = 11 : i64} {
  func.func @_conv1_pool_kernel(%arg0: i32, %arg1: memref<128x16xbf16, #tpu.memory_space<vmem>>, %arg2: memref<128x1xf32, #tpu.memory_space<vmem>>, %arg3: memref<16x128xbf16, #tpu.memory_space<vmem>>, %arg4: memref<1x128xf32, #tpu.memory_space<vmem>>, %arg5: memref<16x128xbf16, #tpu.memory_space<vmem>>) attributes {dimension_semantics = [#tpu.dimension_semantics<parallel>], iteration_bounds = array<i64: 2>, scalar_prefetch = 0 : i64, scratch_operands = 0 : i64, tpu.core_type = #tpu.core_type<tc>, window_params = [{transform_indices = @transform_0, window_bounds = array<i64: 128, 16>}, {transform_indices = @transform_1, window_bounds = array<i64: 128, 1>}, {pipeline_mode = #tpu.pipeline_mode<synchronous>, transform_indices = @transform_2, window_bounds = array<i64: 16, 128>}, {pipeline_mode = #tpu.pipeline_mode<synchronous>, transform_indices = @transform_3, window_bounds = array<i64: 1, 128>}, {transform_indices = @transform_4, window_bounds = array<i64: 16, 128>}]} {
    %c0 = arith.constant 0 : index
    %c0_0 = arith.constant 0 : index
    %0 = vector.load %arg1[%c0, %c0_0] : memref<128x16xbf16, #tpu.memory_space<vmem>>, vector<128x16xbf16>
    %c0_1 = arith.constant 0 : index
    %c0_2 = arith.constant 0 : index
    %1 = vector.load %arg3[%c0_1, %c0_2] : memref<16x128xbf16, #tpu.memory_space<vmem>>, vector<16x128xbf16>
    %cst = arith.constant dense<0.000000e+00> : vector<128x128xf32>
    %2 = tpu.matmul %0, %1, %cst {dimension_numbers = #tpu.dot_dimension_numbers<[1], [0], [0], [1], [0, 0, 1, 1], [], []>} : vector<128x16xbf16>, vector<16x128xbf16>, vector<128x128xf32> -> vector<128x128xf32>
    %c0_3 = arith.constant 0 : index
    %c0_4 = arith.constant 0 : index
    %3 = vector.load %arg4[%c0_3, %c0_4] : memref<1x128xf32, #tpu.memory_space<vmem>>, vector<1x128xf32>
    %4 = vector.broadcast %3 : vector<1x128xf32> to vector<128x128xf32>
    %5 = arith.addf %2, %4 : vector<128x128xf32>
    %cst_5 = arith.constant 0.000000e+00 : f32
    %6 = vector.broadcast %cst_5 : f32 to vector<128x128xf32>
    %7 = arith.maximumf %5, %6 : vector<128x128xf32>
    %c0_6 = arith.constant 0 : index
    %c0_7 = arith.constant 0 : index
    %8 = vector.load %arg2[%c0_6, %c0_7] : memref<128x1xf32, #tpu.memory_space<vmem>>, vector<128x1xf32>
    %9 = vector.broadcast %8 : vector<128x1xf32> to vector<128x128xf32>
    %10 = arith.mulf %7, %9 : vector<128x128xf32>
    %11 = vector.shape_cast %10 : vector<128x128xf32> to vector<16x8x128xf32>
    %12 = vector.extract_strided_slice %11 {offsets = [0, 0, 0], sizes = [16, 1, 128], strides = [1, 1, 1]} : vector<16x8x128xf32> to vector<16x1x128xf32>
    %13 = vector.shape_cast %12 : vector<16x1x128xf32> to vector<16x128xf32>
    %14 = vector.extract_strided_slice %11 {offsets = [0, 1, 0], sizes = [16, 1, 128], strides = [1, 1, 1]} : vector<16x8x128xf32> to vector<16x1x128xf32>
    %15 = vector.shape_cast %14 : vector<16x1x128xf32> to vector<16x128xf32>
    %16 = arith.maximumf %13, %15 : vector<16x128xf32>
    %17 = vector.extract_strided_slice %11 {offsets = [0, 2, 0], sizes = [16, 1, 128], strides = [1, 1, 1]} : vector<16x8x128xf32> to vector<16x1x128xf32>
    %18 = vector.shape_cast %17 : vector<16x1x128xf32> to vector<16x128xf32>
    %19 = arith.maximumf %16, %18 : vector<16x128xf32>
    %20 = vector.extract_strided_slice %11 {offsets = [0, 3, 0], sizes = [16, 1, 128], strides = [1, 1, 1]} : vector<16x8x128xf32> to vector<16x1x128xf32>
    %21 = vector.shape_cast %20 : vector<16x1x128xf32> to vector<16x128xf32>
    %22 = arith.maximumf %19, %21 : vector<16x128xf32>
    %23 = vector.extract_strided_slice %11 {offsets = [0, 4, 0], sizes = [16, 1, 128], strides = [1, 1, 1]} : vector<16x8x128xf32> to vector<16x1x128xf32>
    %24 = vector.shape_cast %23 : vector<16x1x128xf32> to vector<16x128xf32>
    %25 = arith.maximumf %22, %24 : vector<16x128xf32>
    %26 = vector.extract_strided_slice %11 {offsets = [0, 5, 0], sizes = [16, 1, 128], strides = [1, 1, 1]} : vector<16x8x128xf32> to vector<16x1x128xf32>
    %27 = vector.shape_cast %26 : vector<16x1x128xf32> to vector<16x128xf32>
    %28 = arith.maximumf %25, %27 : vector<16x128xf32>
    %29 = vector.extract_strided_slice %11 {offsets = [0, 6, 0], sizes = [16, 1, 128], strides = [1, 1, 1]} : vector<16x8x128xf32> to vector<16x1x128xf32>
    %30 = vector.shape_cast %29 : vector<16x1x128xf32> to vector<16x128xf32>
    %31 = arith.maximumf %28, %30 : vector<16x128xf32>
    %32 = vector.extract_strided_slice %11 {offsets = [0, 7, 0], sizes = [16, 1, 128], strides = [1, 1, 1]} : vector<16x8x128xf32> to vector<16x1x128xf32>
    %33 = vector.shape_cast %32 : vector<16x1x128xf32> to vector<16x128xf32>
    %34 = arith.maximumf %31, %33 : vector<16x128xf32>
    %35 = arith.truncf %34 : vector<16x128xf32> to vector<16x128xbf16>
    %c0_8 = arith.constant 0 : index
    %c0_9 = arith.constant 0 : index
    %36 = vector.load %arg5[%c0_8, %c0_9] : memref<16x128xbf16, #tpu.memory_space<vmem>>, vector<16x128xbf16>
    tpu.vector_store %arg5[%c0_8, %c0_9], %35 {strides = array<i32>} : memref<16x128xbf16, #tpu.memory_space<vmem>>, vector<16x128xbf16>,
    return
  }
  func.func @transform_0(%arg0: i32) -> (i32, i32) {
    %c0_i32 = arith.constant 0 : i32
    %c0_i32_0 = arith.constant 0 : i32
    return %arg0, %c0_i32 : i32, i32
  }
  func.func @transform_1(%arg0: i32) -> (i32, i32) {
    %c0_i32 = arith.constant 0 : i32
    %c0_i32_0 = arith.constant 0 : i32
    return %arg0, %c0_i32 : i32, i32
  }
  func.func @transform_2(%arg0: i32) -> (i32, i32) {
    %c0_i32 = arith.constant 0 : i32
    %c0_i32_0 = arith.constant 0 : i32
    %c0_i32_1 = arith.constant 0 : i32
    return %c0_i32, %c0_i32_0 : i32, i32
  }
  func.func @transform_3(%arg0: i32) -> (i32, i32) {
    %c0_i32 = arith.constant 0 : i32
    %c0_i32_0 = arith.constant 0 : i32
    %c0_i32_1 = arith.constant 0 : i32
    return %c0_i32, %c0_i32_0 : i32, i32
  }
  func.func @transform_4(%arg0: i32) -> (i32, i32) {
    %c0_i32 = arith.constant 0 : i32
    %c0_i32_0 = arith.constant 0 : i32
    return %arg0, %c0_i32 : i32, i32
  }
}

module attributes {stable_mosaic.version = 11 : i64} {
  func.func @_fused_convs_pool_kernel(%arg0: i32, %arg1: memref<1x10x128xbf16, #tpu.memory_space<vmem>>, %arg2: memref<3x1024x128xbf16, #tpu.memory_space<vmem>>, %arg3: memref<3x1x128xf32, #tpu.memory_space<vmem>>, %arg4: memref<1x2x128xf32, #tpu.memory_space<vmem>>, %arg5: memref<1x17x128xbf16, #tpu.memory_space<vmem>>, %arg6: memref<10x1024xbf16, #tpu.memory_space<vmem>>) attributes {dimension_semantics = [#tpu.dimension_semantics<parallel>], iteration_bounds = array<i64: 2>, scalar_prefetch = 0 : i64, scratch_operands = 2 : i64, tpu.core_type = #tpu.core_type<tc>, window_params = [{transform_indices = @transform_0, window_bounds = array<i64: 1, 10, 128>}, {pipeline_mode = #tpu.pipeline_mode<synchronous>, transform_indices = @transform_1, window_bounds = array<i64: 3, 1024, 128>}, {pipeline_mode = #tpu.pipeline_mode<synchronous>, transform_indices = @transform_2, window_bounds = array<i64: 3, 1, 128>}, {transform_indices = @transform_3, window_bounds = array<i64: 1, 2, 128>}]} {
    %cst = arith.constant 0.000000e+00 : bf16
    %0 = vector.broadcast %cst : bf16 to vector<1x3x128xbf16>
    %c0 = arith.constant 0 : index
    %c0_0 = arith.constant 0 : index
    %c0_1 = arith.constant 0 : index
    %1 = vector.load %arg5[%c0, %c0_0, %c0_1] : memref<1x17x128xbf16, #tpu.memory_space<vmem>>, vector<1x3x128xbf16>
    tpu.vector_store %arg5[%c0, %c0_0, %c0_1], %0 {strides = array<i32>} : memref<1x17x128xbf16, #tpu.memory_space<vmem>>, vector<1x3x128xbf16>,
    %cst_2 = arith.constant 0.000000e+00 : bf16
    %2 = vector.broadcast %cst_2 : bf16 to vector<1x4x128xbf16>
    %c0_3 = arith.constant 0 : index
    %c13 = arith.constant 13 : index
    %c0_4 = arith.constant 0 : index
    %3 = vector.load %arg5[%c0_3, %c13, %c0_4] : memref<1x17x128xbf16, #tpu.memory_space<vmem>>, vector<1x4x128xbf16>
    tpu.vector_store %arg5[%c0_3, %c13, %c0_4], %2 {strides = array<i32>} : memref<1x17x128xbf16, #tpu.memory_space<vmem>>, vector<1x4x128xbf16>,
    %c0_5 = arith.constant 0 : index
    %c0_6 = arith.constant 0 : index
    %c0_7 = arith.constant 0 : index
    %4 = vector.load %arg1[%c0_5, %c0_6, %c0_7] : memref<1x10x128xbf16, #tpu.memory_space<vmem>>, vector<1x10x128xbf16>
    %c0_8 = arith.constant 0 : index
    %c3 = arith.constant 3 : index
    %c0_9 = arith.constant 0 : index
    %5 = vector.load %arg5[%c0_8, %c3, %c0_9] : memref<1x17x128xbf16, #tpu.memory_space<vmem>>, vector<1x10x128xbf16>
    tpu.vector_store %arg5[%c0_8, %c3, %c0_9], %4 {strides = array<i32>} : memref<1x17x128xbf16, #tpu.memory_space<vmem>>, vector<1x10x128xbf16>,
    %c0_10 = arith.constant 0 : index
    %c0_11 = arith.constant 0 : index
    %c0_12 = arith.constant 0 : index
    %6 = vector.load %arg5[%c0_10, %c0_11, %c0_12] : memref<1x17x128xbf16, #tpu.memory_space<vmem>>, vector<1x10x128xbf16>
    %7 = vector.shape_cast %6 : vector<1x10x128xbf16> to vector<10x128xbf16>
    %c0_13 = arith.constant 0 : index
    %c0_14 = arith.constant 0 : index
    %8 = vector.load %arg6[%c0_13, %c0_14] : memref<10x1024xbf16, #tpu.memory_space<vmem>>, vector<10x128xbf16>
    tpu.vector_store %arg6[%c0_13, %c0_14], %7 {strides = array<i32>} : memref<10x1024xbf16, #tpu.memory_space<vmem>>, vector<10x128xbf16>,
    %c0_15 = arith.constant 0 : index
    %c1 = arith.constant 1 : index
    %c0_16 = arith.constant 0 : index
    %9 = vector.load %arg5[%c0_15, %c1, %c0_16] : memref<1x17x128xbf16, #tpu.memory_space<vmem>>, vector<1x10x128xbf16>
    %10 = vector.shape_cast %9 : vector<1x10x128xbf16> to vector<10x128xbf16>
    %c0_17 = arith.constant 0 : index
    %c128 = arith.constant 128 : index
    %11 = vector.load %arg6[%c0_17, %c128] : memref<10x1024xbf16, #tpu.memory_space<vmem>>, vector<10x128xbf16>
    tpu.vector_store %arg6[%c0_17, %c128], %10 {strides = array<i32>} : memref<10x1024xbf16, #tpu.memory_space<vmem>>, vector<10x128xbf16>,
    %c0_18 = arith.constant 0 : index
    %c2 = arith.constant 2 : index
    %c0_19 = arith.constant 0 : index
    %12 = vector.load %arg5[%c0_18, %c2, %c0_19] : memref<1x17x128xbf16, #tpu.memory_space<vmem>>, vector<1x10x128xbf16>
    %13 = vector.shape_cast %12 : vector<1x10x128xbf16> to vector<10x128xbf16>
    %c0_20 = arith.constant 0 : index
    %c256 = arith.constant 256 : index
    %14 = vector.load %arg6[%c0_20, %c256] : memref<10x1024xbf16, #tpu.memory_space<vmem>>, vector<10x128xbf16>
    tpu.vector_store %arg6[%c0_20, %c256], %13 {strides = array<i32>} : memref<10x1024xbf16, #tpu.memory_space<vmem>>, vector<10x128xbf16>,
    %c0_21 = arith.constant 0 : index
    %c3_22 = arith.constant 3 : index
    %c0_23 = arith.constant 0 : index
    %15 = vector.load %arg5[%c0_21, %c3_22, %c0_23] : memref<1x17x128xbf16, #tpu.memory_space<vmem>>, vector<1x10x128xbf16>
    %16 = vector.shape_cast %15 : vector<1x10x128xbf16> to vector<10x128xbf16>
    %c0_24 = arith.constant 0 : index
    %c384 = arith.constant 384 : index
    %17 = vector.load %arg6[%c0_24, %c384] : memref<10x1024xbf16, #tpu.memory_space<vmem>>, vector<10x128xbf16>
    tpu.vector_store %arg6[%c0_24, %c384], %16 {strides = array<i32>} : memref<10x1024xbf16, #tpu.memory_space<vmem>>, vector<10x128xbf16>,
    %c0_25 = arith.constant 0 : index
    %c4 = arith.constant 4 : index
    %c0_26 = arith.constant 0 : index
    %18 = vector.load %arg5[%c0_25, %c4, %c0_26] : memref<1x17x128xbf16, #tpu.memory_space<vmem>>, vector<1x10x128xbf16>
    %19 = vector.shape_cast %18 : vector<1x10x128xbf16> to vector<10x128xbf16>
    %c0_27 = arith.constant 0 : index
    %c512 = arith.constant 512 : index
    %20 = vector.load %arg6[%c0_27, %c512] : memref<10x1024xbf16, #tpu.memory_space<vmem>>, vector<10x128xbf16>
    tpu.vector_store %arg6[%c0_27, %c512], %19 {strides = array<i32>} : memref<10x1024xbf16, #tpu.memory_space<vmem>>, vector<10x128xbf16>,
    %c0_28 = arith.constant 0 : index
    %c5 = arith.constant 5 : index
    %c0_29 = arith.constant 0 : index
    %21 = vector.load %arg5[%c0_28, %c5, %c0_29] : memref<1x17x128xbf16, #tpu.memory_space<vmem>>, vector<1x10x128xbf16>
    %22 = vector.shape_cast %21 : vector<1x10x128xbf16> to vector<10x128xbf16>
    %c0_30 = arith.constant 0 : index
    %c640 = arith.constant 640 : index
    %23 = vector.load %arg6[%c0_30, %c640] : memref<10x1024xbf16, #tpu.memory_space<vmem>>, vector<10x128xbf16>
    tpu.vector_store %arg6[%c0_30, %c640], %22 {strides = array<i32>} : memref<10x1024xbf16, #tpu.memory_space<vmem>>, vector<10x128xbf16>,
    %c0_31 = arith.constant 0 : index
    %c6 = arith.constant 6 : index
    %c0_32 = arith.constant 0 : index
    %24 = vector.load %arg5[%c0_31, %c6, %c0_32] : memref<1x17x128xbf16, #tpu.memory_space<vmem>>, vector<1x10x128xbf16>
    %25 = vector.shape_cast %24 : vector<1x10x128xbf16> to vector<10x128xbf16>
    %c0_33 = arith.constant 0 : index
    %c768 = arith.constant 768 : index
    %26 = vector.load %arg6[%c0_33, %c768] : memref<10x1024xbf16, #tpu.memory_space<vmem>>, vector<10x128xbf16>
    tpu.vector_store %arg6[%c0_33, %c768], %25 {strides = array<i32>} : memref<10x1024xbf16, #tpu.memory_space<vmem>>, vector<10x128xbf16>,
    %c0_34 = arith.constant 0 : index
    %c7 = arith.constant 7 : index
    %c0_35 = arith.constant 0 : index
    %27 = vector.load %arg5[%c0_34, %c7, %c0_35] : memref<1x17x128xbf16, #tpu.memory_space<vmem>>, vector<1x10x128xbf16>
    %28 = vector.shape_cast %27 : vector<1x10x128xbf16> to vector<10x128xbf16>
    %c0_36 = arith.constant 0 : index
    %c896 = arith.constant 896 : index
    %29 = vector.load %arg6[%c0_36, %c896] : memref<10x1024xbf16, #tpu.memory_space<vmem>>, vector<10x128xbf16>
    tpu.vector_store %arg6[%c0_36, %c896], %28 {strides = array<i32>} : memref<10x1024xbf16, #tpu.memory_space<vmem>>, vector<10x128xbf16>,
    %c0_37 = arith.constant 0 : index
    %c0_38 = arith.constant 0 : index
    %30 = vector.load %arg6[%c0_37, %c0_38] : memref<10x1024xbf16, #tpu.memory_space<vmem>>, vector<10x1024xbf16>
    %c0_39 = arith.constant 0 : index
    %c0_40 = arith.constant 0 : index
    %c0_41 = arith.constant 0 : index
    %31 = vector.load %arg2[%c0_39, %c0_40, %c0_41] : memref<3x1024x128xbf16, #tpu.memory_space<vmem>>, vector<1x1024x128xbf16>
    %32 = vector.shape_cast %31 : vector<1x1024x128xbf16> to vector<1024x128xbf16>
    %cst_42 = arith.constant dense<0.000000e+00> : vector<10x128xf32>
    %33 = tpu.matmul %30, %32, %cst_42 {dimension_numbers = #tpu.dot_dimension_numbers<[1], [0], [0], [1], [0, 0, 1, 1], [], []>} : vector<10x1024xbf16>, vector<1024x128xbf16>, vector<10x128xf32> -> vector<10x128xf32>
    %c0_43 = arith.constant 0 : index
    %c0_44 = arith.constant 0 : index
    %c0_45 = arith.constant 0 : index
    %34 = vector.load %arg3[%c0_43, %c0_44, %c0_45] : memref<3x1x128xf32, #tpu.memory_space<vmem>>, vector<1x1x128xf32>
    %35 = vector.shape_cast %34 : vector<1x1x128xf32> to vector<1x128xf32>
    %36 = vector.broadcast %35 : vector<1x128xf32> to vector<10x128xf32>
    %37 = arith.addf %33, %36 : vector<10x128xf32>
    %cst_46 = arith.constant 0.000000e+00 : f32
    %38 = vector.broadcast %cst_46 : f32 to vector<10x128xf32>
    %39 = arith.maximumf %37, %38 : vector<10x128xf32>
    %40 = arith.truncf %39 : vector<10x128xf32> to vector<10x128xbf16>
    %c0_47 = arith.constant 0 : index
    %c3_48 = arith.constant 3 : index
    %c0_49 = arith.constant 0 : index
    %41 = vector.load %arg5[%c0_47, %c3_48, %c0_49] : memref<1x17x128xbf16, #tpu.memory_space<vmem>>, vector<1x10x128xbf16>
    %42 = vector.shape_cast %41 : vector<1x10x128xbf16> to vector<10x128xbf16>
    %43 = vector.shape_cast %40 : vector<10x128xbf16> to vector<1x10x128xbf16>
    tpu.vector_store %arg5[%c0_47, %c3_48, %c0_49], %43 {strides = array<i32>} : memref<1x17x128xbf16, #tpu.memory_space<vmem>>, vector<1x10x128xbf16>,
    %c0_50 = arith.constant 0 : index
    %c0_51 = arith.constant 0 : index
    %c0_52 = arith.constant 0 : index
    %44 = vector.load %arg5[%c0_50, %c0_51, %c0_52] : memref<1x17x128xbf16, #tpu.memory_space<vmem>>, vector<1x10x128xbf16>
    %45 = vector.shape_cast %44 : vector<1x10x128xbf16> to vector<10x128xbf16>
    %c0_53 = arith.constant 0 : index
    %c0_54 = arith.constant 0 : index
    %46 = vector.load %arg6[%c0_53, %c0_54] : memref<10x1024xbf16, #tpu.memory_space<vmem>>, vector<10x128xbf16>
    tpu.vector_store %arg6[%c0_53, %c0_54], %45 {strides = array<i32>} : memref<10x1024xbf16, #tpu.memory_space<vmem>>, vector<10x128xbf16>,
    %c0_55 = arith.constant 0 : index
    %c1_56 = arith.constant 1 : index
    %c0_57 = arith.constant 0 : index
    %47 = vector.load %arg5[%c0_55, %c1_56, %c0_57] : memref<1x17x128xbf16, #tpu.memory_space<vmem>>, vector<1x10x128xbf16>
    %48 = vector.shape_cast %47 : vector<1x10x128xbf16> to vector<10x128xbf16>
    %c0_58 = arith.constant 0 : index
    %c128_59 = arith.constant 128 : index
    %49 = vector.load %arg6[%c0_58, %c128_59] : memref<10x1024xbf16, #tpu.memory_space<vmem>>, vector<10x128xbf16>
    tpu.vector_store %arg6[%c0_58, %c128_59], %48 {strides = array<i32>} : memref<10x1024xbf16, #tpu.memory_space<vmem>>, vector<10x128xbf16>,
    %c0_60 = arith.constant 0 : index
    %c2_61 = arith.constant 2 : index
    %c0_62 = arith.constant 0 : index
    %50 = vector.load %arg5[%c0_60, %c2_61, %c0_62] : memref<1x17x128xbf16, #tpu.memory_space<vmem>>, vector<1x10x128xbf16>
    %51 = vector.shape_cast %50 : vector<1x10x128xbf16> to vector<10x128xbf16>
    %c0_63 = arith.constant 0 : index
    %c256_64 = arith.constant 256 : index
    %52 = vector.load %arg6[%c0_63, %c256_64] : memref<10x1024xbf16, #tpu.memory_space<vmem>>, vector<10x128xbf16>
    tpu.vector_store %arg6[%c0_63, %c256_64], %51 {strides = array<i32>} : memref<10x1024xbf16, #tpu.memory_space<vmem>>, vector<10x128xbf16>,
    %c0_65 = arith.constant 0 : index
    %c3_66 = arith.constant 3 : index
    %c0_67 = arith.constant 0 : index
    %53 = vector.load %arg5[%c0_65, %c3_66, %c0_67] : memref<1x17x128xbf16, #tpu.memory_space<vmem>>, vector<1x10x128xbf16>
    %54 = vector.shape_cast %53 : vector<1x10x128xbf16> to vector<10x128xbf16>
    %c0_68 = arith.constant 0 : index
    %c384_69 = arith.constant 384 : index
    %55 = vector.load %arg6[%c0_68, %c384_69] : memref<10x1024xbf16, #tpu.memory_space<vmem>>, vector<10x128xbf16>
    tpu.vector_store %arg6[%c0_68, %c384_69], %54 {strides = array<i32>} : memref<10x1024xbf16, #tpu.memory_space<vmem>>, vector<10x128xbf16>,
    %c0_70 = arith.constant 0 : index
    %c4_71 = arith.constant 4 : index
    %c0_72 = arith.constant 0 : index
    %56 = vector.load %arg5[%c0_70, %c4_71, %c0_72] : memref<1x17x128xbf16, #tpu.memory_space<vmem>>, vector<1x10x128xbf16>
    %57 = vector.shape_cast %56 : vector<1x10x128xbf16> to vector<10x128xbf16>
    %c0_73 = arith.constant 0 : index
    %c512_74 = arith.constant 512 : index
    %58 = vector.load %arg6[%c0_73, %c512_74] : memref<10x1024xbf16, #tpu.memory_space<vmem>>, vector<10x128xbf16>
    tpu.vector_store %arg6[%c0_73, %c512_74], %57 {strides = array<i32>} : memref<10x1024xbf16, #tpu.memory_space<vmem>>, vector<10x128xbf16>,
    %c0_75 = arith.constant 0 : index
    %c5_76 = arith.constant 5 : index
    %c0_77 = arith.constant 0 : index
    %59 = vector.load %arg5[%c0_75, %c5_76, %c0_77] : memref<1x17x128xbf16, #tpu.memory_space<vmem>>, vector<1x10x128xbf16>
    %60 = vector.shape_cast %59 : vector<1x10x128xbf16> to vector<10x128xbf16>
    %c0_78 = arith.constant 0 : index
    %c640_79 = arith.constant 640 : index
    %61 = vector.load %arg6[%c0_78, %c640_79] : memref<10x1024xbf16, #tpu.memory_space<vmem>>, vector<10x128xbf16>
    tpu.vector_store %arg6[%c0_78, %c640_79], %60 {strides = array<i32>} : memref<10x1024xbf16, #tpu.memory_space<vmem>>, vector<10x128xbf16>,
    %c0_80 = arith.constant 0 : index
    %c6_81 = arith.constant 6 : index
    %c0_82 = arith.constant 0 : index
    %62 = vector.load %arg5[%c0_80, %c6_81, %c0_82] : memref<1x17x128xbf16, #tpu.memory_space<vmem>>, vector<1x10x128xbf16>
    %63 = vector.shape_cast %62 : vector<1x10x128xbf16> to vector<10x128xbf16>
    %c0_83 = arith.constant 0 : index
    %c768_84 = arith.constant 768 : index
    %64 = vector.load %arg6[%c0_83, %c768_84] : memref<10x1024xbf16, #tpu.memory_space<vmem>>, vector<10x128xbf16>
    tpu.vector_store %arg6[%c0_83, %c768_84], %63 {strides = array<i32>} : memref<10x1024xbf16, #tpu.memory_space<vmem>>, vector<10x128xbf16>,
    %c0_85 = arith.constant 0 : index
    %c7_86 = arith.constant 7 : index
    %c0_87 = arith.constant 0 : index
    %65 = vector.load %arg5[%c0_85, %c7_86, %c0_87] : memref<1x17x128xbf16, #tpu.memory_space<vmem>>, vector<1x10x128xbf16>
    %66 = vector.shape_cast %65 : vector<1x10x128xbf16> to vector<10x128xbf16>
    %c0_88 = arith.constant 0 : index
    %c896_89 = arith.constant 896 : index
    %67 = vector.load %arg6[%c0_88, %c896_89] : memref<10x1024xbf16, #tpu.memory_space<vmem>>, vector<10x128xbf16>
    tpu.vector_store %arg6[%c0_88, %c896_89], %66 {strides = array<i32>} : memref<10x1024xbf16, #tpu.memory_space<vmem>>, vector<10x128xbf16>,
    %c0_90 = arith.constant 0 : index
    %c0_91 = arith.constant 0 : index
    %68 = vector.load %arg6[%c0_90, %c0_91] : memref<10x1024xbf16, #tpu.memory_space<vmem>>, vector<10x1024xbf16>
    %c1_92 = arith.constant 1 : index
    %c0_93 = arith.constant 0 : index
    %c0_94 = arith.constant 0 : index
    %69 = vector.load %arg2[%c1_92, %c0_93, %c0_94] : memref<3x1024x128xbf16, #tpu.memory_space<vmem>>, vector<1x1024x128xbf16>
    %70 = vector.shape_cast %69 : vector<1x1024x128xbf16> to vector<1024x128xbf16>
    %cst_95 = arith.constant dense<0.000000e+00> : vector<10x128xf32>
    %71 = tpu.matmul %68, %70, %cst_95 {dimension_numbers = #tpu.dot_dimension_numbers<[1], [0], [0], [1], [0, 0, 1, 1], [], []>} : vector<10x1024xbf16>, vector<1024x128xbf16>, vector<10x128xf32> -> vector<10x128xf32>
    %c1_96 = arith.constant 1 : index
    %c0_97 = arith.constant 0 : index
    %c0_98 = arith.constant 0 : index
    %72 = vector.load %arg3[%c1_96, %c0_97, %c0_98] : memref<3x1x128xf32, #tpu.memory_space<vmem>>, vector<1x1x128xf32>
    %73 = vector.shape_cast %72 : vector<1x1x128xf32> to vector<1x128xf32>
    %74 = vector.broadcast %73 : vector<1x128xf32> to vector<10x128xf32>
    %75 = arith.addf %71, %74 : vector<10x128xf32>
    %cst_99 = arith.constant 0.000000e+00 : f32
    %76 = vector.broadcast %cst_99 : f32 to vector<10x128xf32>
    %77 = arith.maximumf %75, %76 : vector<10x128xf32>
    %78 = arith.truncf %77 : vector<10x128xf32> to vector<10x128xbf16>
    %c0_100 = arith.constant 0 : index
    %c3_101 = arith.constant 3 : index
    %c0_102 = arith.constant 0 : index
    %79 = vector.load %arg5[%c0_100, %c3_101, %c0_102] : memref<1x17x128xbf16, #tpu.memory_space<vmem>>, vector<1x10x128xbf16>
    %80 = vector.shape_cast %79 : vector<1x10x128xbf16> to vector<10x128xbf16>
    %81 = vector.shape_cast %78 : vector<10x128xbf16> to vector<1x10x128xbf16>
    tpu.vector_store %arg5[%c0_100, %c3_101, %c0_102], %81 {strides = array<i32>} : memref<1x17x128xbf16, #tpu.memory_space<vmem>>, vector<1x10x128xbf16>,
    %c0_103 = arith.constant 0 : index
    %c0_104 = arith.constant 0 : index
    %c0_105 = arith.constant 0 : index
    %82 = vector.load %arg5[%c0_103, %c0_104, %c0_105] : memref<1x17x128xbf16, #tpu.memory_space<vmem>>, vector<1x10x128xbf16>
    %83 = vector.shape_cast %82 : vector<1x10x128xbf16> to vector<10x128xbf16>
    %c0_106 = arith.constant 0 : index
    %c0_107 = arith.constant 0 : index
    %84 = vector.load %arg6[%c0_106, %c0_107] : memref<10x1024xbf16, #tpu.memory_space<vmem>>, vector<10x128xbf16>
    tpu.vector_store %arg6[%c0_106, %c0_107], %83 {strides = array<i32>} : memref<10x1024xbf16, #tpu.memory_space<vmem>>, vector<10x128xbf16>,
    %c0_108 = arith.constant 0 : index
    %c1_109 = arith.constant 1 : index
    %c0_110 = arith.constant 0 : index
    %85 = vector.load %arg5[%c0_108, %c1_109, %c0_110] : memref<1x17x128xbf16, #tpu.memory_space<vmem>>, vector<1x10x128xbf16>
    %86 = vector.shape_cast %85 : vector<1x10x128xbf16> to vector<10x128xbf16>
    %c0_111 = arith.constant 0 : index
    %c128_112 = arith.constant 128 : index
    %87 = vector.load %arg6[%c0_111, %c128_112] : memref<10x1024xbf16, #tpu.memory_space<vmem>>, vector<10x128xbf16>
    tpu.vector_store %arg6[%c0_111, %c128_112], %86 {strides = array<i32>} : memref<10x1024xbf16, #tpu.memory_space<vmem>>, vector<10x128xbf16>,
    %c0_113 = arith.constant 0 : index
    %c2_114 = arith.constant 2 : index
    %c0_115 = arith.constant 0 : index
    %88 = vector.load %arg5[%c0_113, %c2_114, %c0_115] : memref<1x17x128xbf16, #tpu.memory_space<vmem>>, vector<1x10x128xbf16>
    %89 = vector.shape_cast %88 : vector<1x10x128xbf16> to vector<10x128xbf16>
    %c0_116 = arith.constant 0 : index
    %c256_117 = arith.constant 256 : index
    %90 = vector.load %arg6[%c0_116, %c256_117] : memref<10x1024xbf16, #tpu.memory_space<vmem>>, vector<10x128xbf16>
    tpu.vector_store %arg6[%c0_116, %c256_117], %89 {strides = array<i32>} : memref<10x1024xbf16, #tpu.memory_space<vmem>>, vector<10x128xbf16>,
    %c0_118 = arith.constant 0 : index
    %c3_119 = arith.constant 3 : index
    %c0_120 = arith.constant 0 : index
    %91 = vector.load %arg5[%c0_118, %c3_119, %c0_120] : memref<1x17x128xbf16, #tpu.memory_space<vmem>>, vector<1x10x128xbf16>
    %92 = vector.shape_cast %91 : vector<1x10x128xbf16> to vector<10x128xbf16>
    %c0_121 = arith.constant 0 : index
    %c384_122 = arith.constant 384 : index
    %93 = vector.load %arg6[%c0_121, %c384_122] : memref<10x1024xbf16, #tpu.memory_space<vmem>>, vector<10x128xbf16>
    tpu.vector_store %arg6[%c0_121, %c384_122], %92 {strides = array<i32>} : memref<10x1024xbf16, #tpu.memory_space<vmem>>, vector<10x128xbf16>,
    %c0_123 = arith.constant 0 : index
    %c4_124 = arith.constant 4 : index
    %c0_125 = arith.constant 0 : index
    %94 = vector.load %arg5[%c0_123, %c4_124, %c0_125] : memref<1x17x128xbf16, #tpu.memory_space<vmem>>, vector<1x10x128xbf16>
    %95 = vector.shape_cast %94 : vector<1x10x128xbf16> to vector<10x128xbf16>
    %c0_126 = arith.constant 0 : index
    %c512_127 = arith.constant 512 : index
    %96 = vector.load %arg6[%c0_126, %c512_127] : memref<10x1024xbf16, #tpu.memory_space<vmem>>, vector<10x128xbf16>
    tpu.vector_store %arg6[%c0_126, %c512_127], %95 {strides = array<i32>} : memref<10x1024xbf16, #tpu.memory_space<vmem>>, vector<10x128xbf16>,
    %c0_128 = arith.constant 0 : index
    %c5_129 = arith.constant 5 : index
    %c0_130 = arith.constant 0 : index
    %97 = vector.load %arg5[%c0_128, %c5_129, %c0_130] : memref<1x17x128xbf16, #tpu.memory_space<vmem>>, vector<1x10x128xbf16>
    %98 = vector.shape_cast %97 : vector<1x10x128xbf16> to vector<10x128xbf16>
    %c0_131 = arith.constant 0 : index
    %c640_132 = arith.constant 640 : index
    %99 = vector.load %arg6[%c0_131, %c640_132] : memref<10x1024xbf16, #tpu.memory_space<vmem>>, vector<10x128xbf16>
    tpu.vector_store %arg6[%c0_131, %c640_132], %98 {strides = array<i32>} : memref<10x1024xbf16, #tpu.memory_space<vmem>>, vector<10x128xbf16>,
    %c0_133 = arith.constant 0 : index
    %c6_134 = arith.constant 6 : index
    %c0_135 = arith.constant 0 : index
    %100 = vector.load %arg5[%c0_133, %c6_134, %c0_135] : memref<1x17x128xbf16, #tpu.memory_space<vmem>>, vector<1x10x128xbf16>
    %101 = vector.shape_cast %100 : vector<1x10x128xbf16> to vector<10x128xbf16>
    %c0_136 = arith.constant 0 : index
    %c768_137 = arith.constant 768 : index
    %102 = vector.load %arg6[%c0_136, %c768_137] : memref<10x1024xbf16, #tpu.memory_space<vmem>>, vector<10x128xbf16>
    tpu.vector_store %arg6[%c0_136, %c768_137], %101 {strides = array<i32>} : memref<10x1024xbf16, #tpu.memory_space<vmem>>, vector<10x128xbf16>,
    %c0_138 = arith.constant 0 : index
    %c7_139 = arith.constant 7 : index
    %c0_140 = arith.constant 0 : index
    %103 = vector.load %arg5[%c0_138, %c7_139, %c0_140] : memref<1x17x128xbf16, #tpu.memory_space<vmem>>, vector<1x10x128xbf16>
    %104 = vector.shape_cast %103 : vector<1x10x128xbf16> to vector<10x128xbf16>
    %c0_141 = arith.constant 0 : index
    %c896_142 = arith.constant 896 : index
    %105 = vector.load %arg6[%c0_141, %c896_142] : memref<10x1024xbf16, #tpu.memory_space<vmem>>, vector<10x128xbf16>
    tpu.vector_store %arg6[%c0_141, %c896_142], %104 {strides = array<i32>} : memref<10x1024xbf16, #tpu.memory_space<vmem>>, vector<10x128xbf16>,
    %c0_143 = arith.constant 0 : index
    %c0_144 = arith.constant 0 : index
    %106 = vector.load %arg6[%c0_143, %c0_144] : memref<10x1024xbf16, #tpu.memory_space<vmem>>, vector<10x1024xbf16>
    %c2_145 = arith.constant 2 : index
    %c0_146 = arith.constant 0 : index
    %c0_147 = arith.constant 0 : index
    %107 = vector.load %arg2[%c2_145, %c0_146, %c0_147] : memref<3x1024x128xbf16, #tpu.memory_space<vmem>>, vector<1x1024x128xbf16>
    %108 = vector.shape_cast %107 : vector<1x1024x128xbf16> to vector<1024x128xbf16>
    %cst_148 = arith.constant dense<0.000000e+00> : vector<10x128xf32>
    %109 = tpu.matmul %106, %108, %cst_148 {dimension_numbers = #tpu.dot_dimension_numbers<[1], [0], [0], [1], [0, 0, 1, 1], [], []>} : vector<10x1024xbf16>, vector<1024x128xbf16>, vector<10x128xf32> -> vector<10x128xf32>
    %c2_149 = arith.constant 2 : index
    %c0_150 = arith.constant 0 : index
    %c0_151 = arith.constant 0 : index
    %110 = vector.load %arg3[%c2_149, %c0_150, %c0_151] : memref<3x1x128xf32, #tpu.memory_space<vmem>>, vector<1x1x128xf32>
    %111 = vector.shape_cast %110 : vector<1x1x128xf32> to vector<1x128xf32>
    %112 = vector.broadcast %111 : vector<1x128xf32> to vector<10x128xf32>
    %113 = arith.addf %109, %112 : vector<10x128xf32>
    %cst_152 = arith.constant 0.000000e+00 : f32
    %114 = vector.broadcast %cst_152 : f32 to vector<10x128xf32>
    %115 = arith.maximumf %113, %114 : vector<10x128xf32>
    %116 = vector.shape_cast %115 : vector<10x128xf32> to vector<1x10x128xf32>
    %117 = vector.extract_strided_slice %116 {offsets = [0, 0, 0], sizes = [1, 1, 128], strides = [1, 1, 1]} : vector<1x10x128xf32> to vector<1x1x128xf32>
    %118 = vector.shape_cast %117 : vector<1x1x128xf32> to vector<1x128xf32>
    %119 = vector.extract_strided_slice %116 {offsets = [0, 1, 0], sizes = [1, 1, 128], strides = [1, 1, 1]} : vector<1x10x128xf32> to vector<1x1x128xf32>
    %120 = vector.shape_cast %119 : vector<1x1x128xf32> to vector<1x128xf32>
    %121 = arith.maximumf %118, %120 : vector<1x128xf32>
    %122 = vector.extract_strided_slice %116 {offsets = [0, 2, 0], sizes = [1, 1, 128], strides = [1, 1, 1]} : vector<1x10x128xf32> to vector<1x1x128xf32>
    %123 = vector.shape_cast %122 : vector<1x1x128xf32> to vector<1x128xf32>
    %124 = arith.maximumf %121, %123 : vector<1x128xf32>
    %125 = vector.extract_strided_slice %116 {offsets = [0, 3, 0], sizes = [1, 1, 128], strides = [1, 1, 1]} : vector<1x10x128xf32> to vector<1x1x128xf32>
    %126 = vector.shape_cast %125 : vector<1x1x128xf32> to vector<1x128xf32>
    %127 = arith.maximumf %124, %126 : vector<1x128xf32>
    %c0_153 = arith.constant 0 : index
    %c0_154 = arith.constant 0 : index
    %c0_155 = arith.constant 0 : index
    %128 = vector.load %arg4[%c0_153, %c0_154, %c0_155] : memref<1x2x128xf32, #tpu.memory_space<vmem>>, vector<1x1x128xf32>
    %129 = vector.shape_cast %128 : vector<1x1x128xf32> to vector<1x128xf32>
    %130 = vector.shape_cast %127 : vector<1x128xf32> to vector<1x1x128xf32>
    tpu.vector_store %arg4[%c0_153, %c0_154, %c0_155], %130 {strides = array<i32>} : memref<1x2x128xf32, #tpu.memory_space<vmem>>, vector<1x1x128xf32>,
    %131 = vector.extract_strided_slice %116 {offsets = [0, 4, 0], sizes = [1, 1, 128], strides = [1, 1, 1]} : vector<1x10x128xf32> to vector<1x1x128xf32>
    %132 = vector.shape_cast %131 : vector<1x1x128xf32> to vector<1x128xf32>
    %133 = vector.extract_strided_slice %116 {offsets = [0, 5, 0], sizes = [1, 1, 128], strides = [1, 1, 1]} : vector<1x10x128xf32> to vector<1x1x128xf32>
    %134 = vector.shape_cast %133 : vector<1x1x128xf32> to vector<1x128xf32>
    %135 = arith.maximumf %132, %134 : vector<1x128xf32>
    %136 = vector.extract_strided_slice %116 {offsets = [0, 6, 0], sizes = [1, 1, 128], strides = [1, 1, 1]} : vector<1x10x128xf32> to vector<1x1x128xf32>
    %137 = vector.shape_cast %136 : vector<1x1x128xf32> to vector<1x128xf32>
    %138 = arith.maximumf %135, %137 : vector<1x128xf32>
    %139 = vector.extract_strided_slice %116 {offsets = [0, 7, 0], sizes = [1, 1, 128], strides = [1, 1, 1]} : vector<1x10x128xf32> to vector<1x1x128xf32>
    %140 = vector.shape_cast %139 : vector<1x1x128xf32> to vector<1x128xf32>
    %141 = arith.maximumf %138, %140 : vector<1x128xf32>
    %c0_156 = arith.constant 0 : index
    %c1_157 = arith.constant 1 : index
    %c0_158 = arith.constant 0 : index
    %142 = vector.load %arg4[%c0_156, %c1_157, %c0_158] : memref<1x2x128xf32, #tpu.memory_space<vmem>>, vector<1x1x128xf32>
    %143 = vector.shape_cast %142 : vector<1x1x128xf32> to vector<1x128xf32>
    %144 = vector.shape_cast %141 : vector<1x128xf32> to vector<1x1x128xf32>
    tpu.vector_store %arg4[%c0_156, %c1_157, %c0_158], %144 {strides = array<i32>} : memref<1x2x128xf32, #tpu.memory_space<vmem>>, vector<1x1x128xf32>,
    return
  }
  func.func @transform_0(%arg0: i32) -> (i32, i32, i32) {
    %c0_i32 = arith.constant 0 : i32
    %c0_i32_0 = arith.constant 0 : i32
    %c0_i32_1 = arith.constant 0 : i32
    return %arg0, %c0_i32, %c0_i32_0 : i32, i32, i32
  }
  func.func @transform_1(%arg0: i32) -> (i32, i32, i32) {
    %c0_i32 = arith.constant 0 : i32
    %c0_i32_0 = arith.constant 0 : i32
    %c0_i32_1 = arith.constant 0 : i32
    %c0_i32_2 = arith.constant 0 : i32
    return %c0_i32, %c0_i32_0, %c0_i32_1 : i32, i32, i32
  }
  func.func @transform_2(%arg0: i32) -> (i32, i32, i32) {
    %c0_i32 = arith.constant 0 : i32
    %c0_i32_0 = arith.constant 0 : i32
    %c0_i32_1 = arith.constant 0 : i32
    %c0_i32_2 = arith.constant 0 : i32
    return %c0_i32, %c0_i32_0, %c0_i32_1 : i32, i32, i32
  }
  func.func @transform_3(%arg0: i32) -> (i32, i32, i32) {
    %c0_i32 = arith.constant 0 : i32
    %c0_i32_0 = arith.constant 0 : i32
    %c0_i32_1 = arith.constant 0 : i32
    return %arg0, %c0_i32, %c0_i32_0 : i32, i32, i32
  }
}

</mosaic_0001>

<bundles_post_ra>
// kernel: feature_extractor_forward.2
= control target key start
LH: loop header
LB: loop body
LE: loop exit
PB: predicated region body
PF: predicated region fallthrough
CT: control target
= control target key end

     0   :  { %s1232_s15 = smov 0   ;;  %s1543_s0 = inlined_call_operand.vmem [shape: bf16[256,16], index: 0, kind: input, shape index: {}]   ;;  %s1544_s1 = inlined_call_operand.vmem [shape: f32[256,1], index: 1, kind: input, shape index: {}]   ;;  %s1545_s2 = inlined_call_operand.vmem [shape: bf16[16,128], index: 2, kind: input, shape index: {}]   ;;  %s1546_s3 = inlined_call_operand.vmem [shape: f32[1,128], index: 3, kind: input, shape index: {}]   ;;  %s1547_s4 = inlined_call_operand.vmem [shape: bf16[32,128], index: 4, kind: output, shape index: {}]  }
   0x1 LB: > { %s1086_s16 = sadd.s32 4294967295, %s1204_s15   ;;  %p1090_p0 = scmp.ge.s32.totalorder %s1204_s15, 1  ;;  %s1204_s15 = sphi %s1232_s15, %s14_s15  }
   0x2   : > { %p174_p1 = scmp.lt.s32.totalorder %s1204_s15, 3 }
   0x4   : > { %p175_p2 = pnand %p1090_p0, %p174_p1 }
   0x5   : > { %s1091_s19 = sshll.u32 (!%p175_p2), %s1086_s16, 4  ;;  %s1500_s30 = sshll.u32 (!%p175_p2), %s1086_s16, 1 }
   0x6   : > { %178 = sbr.rel (%p175_p2) target bundleno = 304 (0x130), region = 36  ;;  %p206_p3 = scmp.lt.s32.totalorder (!%p175_p2), %s1091_s19, 31 }
   0x7   : > { %p218_p4 = scmp.lt.s32.totalorder (!%p175_p2), %s1500_s30, 3 }
   0xb   : > { %v1189_v0 = vld [vmem:[%s1545_s2] sm:$0xff]   ;;  %s1549_s19 = smov (!%p206_p3, %s1091_s19), 31  ;;  %v1206_v1 = vmov 0   ;;  %vm295_vm0 = vcmask 130048   ;;  %vm978_vm1 = vcmask 1041409   ;;  %vm981_vm2 = vcmask 1042434  }
   0xc   : > { %1158 = vmatprep.subr.bf16.mxu0 %v1189_v0  ;;  %1176 = vmatprep.subr.bf16.mxu1 %v1189_v0  ;;  %s1092_s20 = sshll.u32 %s1549_s19, 2  ;;  %s1094_s24 = sshll.u32 %s1549_s19, 3  ;;  %v1284_v28 = vld [vmem:[%s1546_s3] ss:$0 sm:$0xff]  ;;  %vm984_vm3 = vcmask 1043459   ;;  %vm987_vm4 = vcmask 1044484  }
   0xd   : > { %1159 = vmatpush3.bf16.msra.mxu0 %v1189_v0  ;;  %1177 = vmatpush3.bf16.msra.mxu1 %v1189_v0  ;;  %s209_s23 = scalar_lea.vmem %s1543_s0, %s1092_s20  ;;  %s1255_s27 = scalar_lea.vmem %s1544_s1, %s1094_s24  ;;  %vm990_vm5 = vcmask 1045509   ;;  %vm993_vm6 = vcmask 1046534   ;;  %vm996_vm7 = vcmask 1047559  }
   0xe   : > { %1187 = vset.pattern.permute.xlu0 %v1206_v1  ;;  %1188 = vset.pattern.permute.xlu1 %v1206_v1  ;;  %v1190_v2 = vld [vmem:[%s209_s23] sm:$0xff]   ;;  %v1192_v4 = vld [vmem:[%s209_s23 + $0x8] sm:$0xff]   ;;  %v1194_v6 = vld [vmem:[%s209_s23 + $0x10] sm:$0xff]   ;;  %s1551_s30 = smov (!%p218_p4, %s1500_s30), 3 }
   0xf   : > { %v1191_v3 = vld [vmem:[%s209_s23 + $0x20] sm:$0xff]   ;;  %1160 = vmatprep.mubr.msk.bf16.mxu0 %vm295_vm0, %v1190_v2  ;;  %v1193_v5 = vld [vmem:[%s209_s23 + $0x28] sm:$0xff]   ;;  %v1195_v7 = vld [vmem:[%s209_s23 + $0x30] sm:$0xff]   ;;  %s1096_s5 = sshll.u32 %s1551_s30, 2 }
  0x10   : > { %1168 = vmatprep.mubr.msk.bf16.mxu1 %vm295_vm0, %v1191_v3  ;;  %1161 = vmatmul.mubr.msk.bf16.vlgmr.msra.gmra.mxu0 %vm295_vm0, %v1192_v4  ;;  %v1196_v8 = vld [vmem:[%s209_s23 + $0x18] sm:$0xff]   ;;  %v434_v9 = vld [vmem:[%s1255_s27 + $0x8] sm:$0xff]  ;;  %v435_v12 = vld [vmem:[%s1255_s27 + $0x10] sm:$0xff]  ;;  %s221_s8 = scalar_lea.vmem %s1547_s4, %s1096_s5 }
  0x11   : > { %1169 = vmatmul.mubr.msk.bf16.vlgmr.msra.gmra.mxu1 %vm295_vm0, %v1193_v5  ;;  %1164 = vmatprep.mubr.msk.bf16.mxu0 %vm295_vm0, %v1194_v6  ;;  %v442_v10 = vld [vmem:[%s1255_s27 + $0x48] sm:$0xff]  ;;  %v1197_v11 = vld [vmem:[%s209_s23 + $0x38] sm:$0xff]   ;;  %v433_v13 = vld [vmem:[%s1255_s27] sm:$0xff] }
  0x12   : > { %1172 = vmatprep.mubr.msk.bf16.mxu1 %vm295_vm0, %v1195_v7  ;;  %456 = vperm.xlu0 %1187, %v434_v9   ;;  %v436_v14 = vld [vmem:[%s1255_s27 + $0x18] sm:$0xff]  ;;  %v443_v15 = vld [vmem:[%s1255_s27 + $0x50] sm:$0xff]  ;;  %v437_v16 = vld [vmem:[%s1255_s27 + $0x20] sm:$0xff] }
  0x13   : > { %496 = vperm.xlu1 %1188, %v442_v10   ;;  %v441_v17 = vld [vmem:[%s1255_s27 + $0x40] sm:$0xff]  ;;  %v444_v18 = vld [vmem:[%s1255_s27 + $0x58] sm:$0xff]  ;;  %v438_v19 = vld [vmem:[%s1255_s27 + $0x28] sm:$0xff] }
  0x14   : > { %v445_v20 = vld [vmem:[%s1255_s27 + $0x60] sm:$0xff]  ;;  %v439_v21 = vld [vmem:[%s1255_s27 + $0x30] sm:$0xff]  ;;  %v446_v22 = vld [vmem:[%s1255_s27 + $0x68] sm:$0xff] }
  0x15   : > { %v440_v23 = vld [vmem:[%s1255_s27 + $0x38] sm:$0xff]  ;;  %v447_v24 = vld [vmem:[%s1255_s27 + $0x70] sm:$0xff] }
  0x16   : > { %461 = vperm.xlu0 %1187, %v435_v12   ;;  %v448_v25 = vld [vmem:[%s1255_s27 + $0x78] sm:$0xff] }
  0x17   : > { %451 = vperm.xlu1 %1188, %v433_v13  }
  0x18   : > { %1165 = vmatmul.mubr.msk.bf16.gmra.mxu0 %vm295_vm0, %v1196_v8 }
  0x19   : > { %1173 = vmatmul.mubr.msk.bf16.gmra.mxu1 %vm295_vm0, %v1197_v11 }
  0x1a   : > { %466 = vperm.xlu0 %1187, %v436_v14  }
  0x1b   : > { %501 = vperm.xlu1 %1188, %v443_v15  }
  0x1e   : > { %471 = vperm.xlu0 %1187, %v437_v16  }
  0x1f   : > { %491 = vperm.xlu1 %1188, %v441_v17  }
  0x22   : > { %506 = vperm.xlu0 %1187, %v444_v18  }
  0x23   : > { %476 = vperm.xlu1 %1188, %v438_v19  }
  0x26   : > { %511 = vperm.xlu0 %1187, %v445_v20  }
  0x27   : > { %481 = vperm.xlu1 %1188, %v439_v21  }
  0x2a   : > { %516 = vperm.xlu0 %1187, %v446_v22  }
  0x2b   : > { %486 = vperm.xlu1 %1188, %v440_v23  }
  0x2e   : > { %521 = vperm.xlu0 %1187, %v447_v24  }
  0x2f   : > { %526 = vperm.xlu1 %1188, %v448_v25  }
  0x8d   : > { %v1279_v27 = vpop.permute.xlu0 %456 }
  0x8e   : > { %v1277_v26 = vpop.permute.xlu1 %496 }
  0x91   : > { %v462_v31 = vpop.permute.xlu0 %461 }
  0x92   : > { %v452_v29 = vpop.permute.xlu1 %451 }
  0x95   : > { %v467_v43 = vpop.permute.xlu0 %466 }
  0x96   : > { %v502_v38 = vpop.permute.xlu1 %501 }
  0x99   : > { %v1302_v57 = vpop.permute.xlu0 %471 }
  0x9a   : > { %v492_v62 = vpop.permute.xlu1 %491 }
  0x9d   : > { %v507_v7 = vpop.permute.xlu0 %506 }
  0xd0   : > { %v1162_v30 = vpop.f32.mrf.mxu0 }
  0xd1   : > { %v363_v32 = vadd.f32 %v1162_v30, %v1284_v28  ;;  %v1170_v33 = vpop.f32.mrf.mxu1 }
  0xd2   : > { %v395_v34 = vadd.f32 %v1170_v33, %v1284_v28  ;;  %v354_v35 = vpop.f32.mrf.mxu0 }
  0xd3   : > { %v419_v36 = vmax.f32 %v363_v32, 0.0  ;;  %v355_v40 = vadd.f32 %v1284_v28, %v354_v35  ;;  %v386_v41 = vpop.f32.mrf.mxu1 }
  0xd4   : > { %v427_v37 = vmax.f32 %v395_v34, 0.0  ;;  %v1163_v45 = vpop.f32.mrf.mxu0  ;;  %v387_v47 = vadd.f32 %v1284_v28, %v386_v41 }
  0xd5   : > { %v1288_v39 = vmul.f32 %v462_v31, %v419_v36  ;;  %v417_v49 = vmax.f32 %v355_v40, 0.0  ;;  %v1171_v50 = vpop.f32.mrf.mxu1  ;;  %v366_v52 = vadd.f32 %v1163_v45, %v1284_v28 }
  0xd6   : > { %v1291_v42 = vmul.f32 %v502_v38, %v427_v37  ;;  %v425_v55 = vmax.f32 %v387_v47, 0.0  ;;  %v398_v56 = vadd.f32 %v1171_v50, %v1284_v28  ;;  %v357_v20 = vpop.f32.mrf.mxu0 }
  0xd7   : > { %v563_v44 = vrot.slane %v1288_v39, 1  ;;  %v611_v53 = vrot.slane %v1288_v39, 2  ;;  %v1304_v59 = vmul.f32 %v452_v29, %v417_v49  ;;  %v420_v61 = vmax.f32 %v366_v52, 0.0  ;;  %v389_v21 = vpop.f32.mrf.mxu1 }
  0xd8   : > { %v571_v46 = vrot.slane %v1291_v42, 1  ;;  %v619_v54 = vrot.slane %v1291_v42, 2  ;;  %v659_v63 = vrot.slane %v1288_v39, 3  ;;  %v667_v0 = vrot.slane %v1291_v42, 3  ;;  %v1166_v49 = vpop.f32.mrf.mxu0 }
  0xd9   : > { %v595_v48 = vmax.f32 %v1288_v39, %v563_v44  ;;  %v1308_v1 = vmul.f32 %v492_v62, %v425_v55  ;;  %v428_v2 = vmax.f32 %v398_v56, 0.0  ;;  %v561_v4 = vrot.slane %v1304_v59, 1 }
  0xda   : > { %v603_v51 = vmax.f32 %v1291_v42, %v571_v46  ;;  %v1311_v6 = vmul.f32 %v467_v43, %v420_v61  ;;  %v707_v8 = vrot.slane %v1288_v39, 4  ;;  %v715_v9 = vrot.slane %v1291_v42, 4 }
  0xdb   : > { %v643_v58 = vmax.f32 %v595_v48, %v611_v53  ;;  %v569_v10 = vrot.slane %v1308_v1, 1  ;;  %v1317_v12 = vmul.f32 %v507_v7, %v428_v2  ;;  %v755_v14 = vrot.slane %v1288_v39, 5  ;;  %v1352_v2 = vpop.permute.xlu1 %476 }
  0xdc   : > { %v651_v60 = vmax.f32 %v603_v51, %v619_v54  ;;  %v564_v11 = vrot.slane %v1311_v6, 1  ;;  %v593_v15 = vmax.f32 %v1304_v59, %v561_v4  ;;  %v803_v16 = vrot.slane %v1288_v39, 6 }
  0xdd   : > { %v691_v3 = vmax.f32 %v643_v58, %v659_v63  ;;  %v612_v19 = vrot.slane %v1311_v6, 2  ;;  %v851_v22 = vrot.slane %v1288_v39, 7  ;;  %v763_v23 = vrot.slane %v1291_v42, 5 }
  0xde   : > { %v699_v5 = vmax.f32 %v651_v60, %v667_v0  ;;  %v596_v18 = vmax.f32 %v1311_v6, %v564_v11  ;;  %v811_v24 = vrot.slane %v1291_v42, 6  ;;  %v609_v25 = vrot.slane %v1304_v59, 2  ;;  %v1344_v60 = vpop.permute.xlu0 %511 }
  0xdf   : > { %v739_v13 = vmax.f32 %v691_v3, %v707_v8  ;;  %v859_v29 = vrot.slane %v1291_v42, 7  ;;  %v601_v30 = vmax.f32 %v1308_v1, %v569_v10  ;;  %v572_v32 = vrot.slane %v1317_v12, 1 }
  0xe0   : > { %v747_v17 = vmax.f32 %v699_v5, %v715_v9  ;;  %v644_v31 = vmax.f32 %v596_v18, %v612_v19  ;;  %v641_v34 = vmax.f32 %v593_v15, %v609_v25  ;;  %v358_v35 = vadd.f32 %v1284_v28, %v357_v20 }
  0xe1   : > { %v787_v33 = vmax.f32 %v739_v13, %v755_v14  ;;  %v390_v36 = vadd.f32 %v1284_v28, %v389_v21  ;;  %v617_v38 = vrot.slane %v1308_v1, 2  ;;  %v660_v39 = vrot.slane %v1311_v6, 3 }
  0xe2   : > { %v795_v37 = vmax.f32 %v747_v17, %v763_v23  ;;  %v604_v40 = vmax.f32 %v1317_v12, %v572_v32  ;;  %v657_v41 = vrot.slane %v1304_v59, 3  ;;  %v705_v42 = vrot.slane %v1304_v59, 4  ;;  %v370_v32 = vpop.f32.mrf.mxu0 }
  0xe3   : > { %v753_v43 = vrot.slane %v1304_v59, 5  ;;  %v801_v44 = vrot.slane %v1304_v59, 6  ;;  %v849_v45 = vrot.slane %v1304_v59, 7  ;;  %v649_v46 = vmax.f32 %v601_v30, %v617_v38 }
  0xe4   : > { %v692_v47 = vmax.f32 %v644_v31, %v660_v39  ;;  %v620_v48 = vrot.slane %v1317_v12, 2  ;;  %v835_v50 = vmax.f32 %v787_v33, %v803_v16  ;;  %v689_v51 = vmax.f32 %v641_v34, %v657_v41  ;;  %v482_v33 = vpop.permute.xlu1 %481 }
  0xe5   : > { %v665_v52 = vrot.slane %v1308_v1, 3  ;;  %v418_v53 = vmax.f32 %v358_v35, 0.0  ;;  %v843_v54 = vmax.f32 %v795_v37, %v811_v24  ;;  %v708_v55 = vrot.slane %v1311_v6, 4  ;;  %v1367_v24 = vpop.permute.xlu0 %516 }
  0xe6   : > { %v652_v56 = vmax.f32 %v604_v40, %v620_v48  ;;  %v426_v58 = vmax.f32 %v390_v36, 0.0  ;;  %v713_v61 = vrot.slane %v1308_v1, 4  ;;  %v761_v62 = vrot.slane %v1308_v1, 5 }
  0xe7   : > { %v1349_v63 = vmul.f32 %v1279_v27, %v418_v53  ;;  %v379_v0 = vadd.f32 %v1166_v49, %v1284_v28  ;;  %v697_v3 = vmax.f32 %v649_v46, %v665_v52  ;;  %v740_v4 = vmax.f32 %v692_v47, %v708_v55  ;;  %v1174_v27 = vpop.f32.mrf.mxu1 }
  0xe8   : > { %v668_v5 = vrot.slane %v1317_v12, 3  ;;  %v1356_v7 = vmul.f32 %v1277_v26, %v426_v58  ;;  %v883_v8 = vmax.f32 %v835_v50, %v851_v22  ;;  %v809_v9 = vrot.slane %v1308_v1, 6 }
  0xe9   : > { %v857_v10 = vrot.slane %v1308_v1, 7  ;;  %v562_v11 = vrot.slane %v1349_v63, 1  ;;  %v891_v13 = vmax.f32 %v843_v54, %v859_v29  ;;  %v737_v14 = vmax.f32 %v689_v51, %v705_v42  ;;  %v402_v42 = vpop.f32.mrf.mxu1  ;;  %v522_v58 = vpop.permute.xlu0 %521 }
  0xea   : > { %v756_v15 = vrot.slane %v1311_v6, 5  ;;  %v700_v16 = vmax.f32 %v652_v56, %v668_v5  ;;  %v610_v18 = vrot.slane %v1349_v63, 2  ;;  %v570_v26 = vrot.slane %v1356_v7, 1 }
  0xeb   : > { %v594_v17 = vmax.f32 %v1349_v63, %v562_v11  ;;  %v423_v19 = vmax.f32 %v379_v0, 0.0  ;;  %v745_v20 = vmax.f32 %v697_v3, %v713_v61  ;;  %v716_v22 = vrot.slane %v1317_v12, 4 }
  0xec   : > { %v788_v21 = vmax.f32 %v740_v4, %v756_v15  ;;  %v411_v23 = vadd.f32 %v1174_v27, %v1284_v28  ;;  %v658_v29 = vrot.slane %v1349_v63, 3  ;;  %v602_v30 = vmax.f32 %v1356_v7, %v570_v26 }
  0xed   : > { %v642_v25 = vmax.f32 %v594_v17, %v610_v18  ;;  %v618_v31 = vrot.slane %v1356_v7, 2  ;;  %v785_v34 = vmax.f32 %v737_v14, %v753_v43  ;;  %v804_v35 = vrot.slane %v1311_v6, 6 }
  0xee   : > { %v748_v36 = vmax.f32 %v700_v16, %v716_v22  ;;  %v706_v37 = vrot.slane %v1349_v63, 4  ;;  %v666_v40 = vrot.slane %v1356_v7, 3  ;;  %v1375_v41 = vmul.f32 %v482_v33, %v423_v19 }
  0xef   : > { %v690_v38 = vmax.f32 %v642_v25, %v658_v29  ;;  %v650_v39 = vmax.f32 %v602_v30, %v618_v31  ;;  %v1135_v46 = vpack.c.bf16 %v883_v8, %v883_v8  ;;  %v793_v47 = vmax.f32 %v745_v20, %v761_v62 }
  0xf0   : > { %v431_v48 = vmax.f32 %v411_v23, 0.0  ;;  %v371_v49 = vadd.f32 %v1284_v28, %v370_v32  ;;  %v836_v50 = vmax.f32 %v788_v21, %v804_v35  ;;  %v764_v43 = vrot.slane %v1317_v12, 5 }
  0xf1   : > { %v738_v51 = vmax.f32 %v690_v38, %v706_v37  ;;  %v698_v52 = vmax.f32 %v650_v39, %v666_v40  ;;  %v852_v53 = vrot.slane %v1311_v6, 7  ;;  %v754_v54 = vrot.slane %v1349_v63, 5 }
  0xf2   : > { %v567_v55 = vrot.slane %v1375_v41, 1  ;;  %v403_v56 = vadd.f32 %v1284_v28, %v402_v42  ;;  %v1143_v61 = vpack.c.bf16 %v891_v13, %v891_v13  ;;  %v833_v62 = vmax.f32 %v785_v34, %v801_v44 }
  0xf3   : > { %v796_v0 = vmax.f32 %v748_v36, %v764_v43  ;;  %v714_v3 = vrot.slane %v1356_v7, 4  ;;  %v841_v4 = vmax.f32 %v793_v47, %v809_v9  ;;  %v786_v5 = vmax.f32 %v738_v51, %v754_v54 }
  0xf4   : > { %v1386_v8 = vmul.f32 %v522_v58, %v431_v48  ;;  %v421_v11 = vmax.f32 %v371_v49, 0.0  ;;  %v1388_v6 = vunpack.c.l.b16 %v1135_v46  ;;  %v884_v27 = vmax.f32 %v836_v50, %v852_v53  ;;  %v1167_v48 = vpop.f32.mrf.mxu0 }
  0xf5   : > { %v812_v14 = vrot.slane %v1317_v12, 6  ;;  %v746_v15 = vmax.f32 %v698_v52, %v714_v3  ;;  %v802_v16 = vrot.slane %v1349_v63, 6  ;;  %v599_v13 = vmax.f32 %v1375_v41, %v567_v55  ;;  %v487_v3 = vpop.permute.xlu1 %486 }
  0xf6   : > { %v575_v44 = vrot.slane %v1386_v8, 1  ;;  %v429_v17 = vmax.f32 %v403_v56, 0.0  ;;  %v1394_v18 = vunpack.c.l.b16 %v1143_v61  ;;  %v881_v9 = vmax.f32 %v833_v62, %v849_v45 }
  0xf7   : > { %v844_v26 = vmax.f32 %v796_v0, %v812_v14  ;;  %v762_v19 = vrot.slane %v1356_v7, 5  ;;  %v889_v20 = vmax.f32 %v841_v4, %v857_v10  ;;  %v834_v21 = vmax.f32 %v786_v5, %v802_v16  ;;  %v1175_v0 = vpop.f32.mrf.mxu1 }
  0xf8   : > { %v615_v22 = vrot.slane %v1375_v41, 2  ;;  %v1403_v23 = vmul.f32 %v1302_v57, %v421_v11  ;;  %v1136_v25 = vpack.c.bf16 %v884_v27, %v884_v27  ;;  %v860_v29 = vrot.slane %v1317_v12, 7  ;;  %v373_v27 = vpop.f32.mrf.mxu0 }
  0xf9   : > { %v850_v30 = vrot.slane %v1349_v63, 7  ;;  %v794_v31 = vmax.f32 %v746_v15, %v762_v19  ;;  %v607_v45 = vmax.f32 %v1386_v8, %v575_v44  ;;  %v1410_v1 = vmul.f32 %v1344_v60, %v429_v17 }
  0xfa   : > { %v647_v59 = vmax.f32 %v599_v13, %v615_v22  ;;  %v565_v32 = vrot.slane %v1403_v23, 1  ;;  %v980_v10 = vrot.slane %v1388_v6, 6  ;;  %v892_v33 = vmax.f32 %v844_v26, %v860_v29 }
  0xfb   : > { %v810_v57 = vrot.slane %v1356_v7, 6  ;;  %v663_v34 = vrot.slane %v1375_v41, 3  ;;  %v882_v35 = vmax.f32 %v834_v21, %v850_v30  ;;  %v623_v12 = vrot.slane %v1386_v8, 2 }
  0xfc   : > { %v597_v63 = vmax.f32 %v1403_v23, %v565_v32  ;;  %v613_v36 = vrot.slane %v1403_v23, 2  ;;  %v1133_v37 = vpack.c.bf16 %v881_v9, %v881_v9  ;;  %v1141_v38 = vpack.c.bf16 %v889_v20, %v889_v20 }
  0xfd   : > { %v1418_v39 = vunpack.c.l.b16 %v1136_v25  ;;  %v842_v60 = vmax.f32 %v794_v31, %v810_v57  ;;  %v695_v40 = vmax.f32 %v647_v59, %v663_v34  ;;  %v655_v42 = vmax.f32 %v607_v45, %v623_v12  ;;  %v405_v25 = vpop.f32.mrf.mxu1  ;;  %v527_v57 = vpop.permute.xlu1 %526 }
  0xfe   : > { %v645_v46 = vmax.f32 %v597_v63, %v613_v36  ;;  %v573_v47 = vrot.slane %v1410_v1, 1  ;;  %v1000_v49 = vrot.slane %v1394_v18, 6  ;;  %v1144_v50 = vpack.c.bf16 %v892_v33, %v892_v33 }
  0xff   : > { %v858_v43 = vrot.slane %v1356_v7, 7  ;;  %v711_v51 = vrot.slane %v1375_v41, 4  ;;  %v1134_v52 = vpack.c.bf16 %v882_v35, %v882_v35  ;;  %v671_v53 = vrot.slane %v1386_v8, 3 }
 0x100   : > { %v661_v54 = vrot.slane %v1403_v23, 3  ;;  %v605_v55 = vmax.f32 %v1410_v1, %v573_v47  ;;  %v961_v56 = vunpack.c.l.b16 %v1133_v37  ;;  %v1427_v58 = vunpack.c.l.b16 %v1141_v38 }
 0x101   : > { %v983_v61 = vrot.slane %v1418_v39, 5  ;;  %v890_v62 = vmax.f32 %v842_v60, %v858_v43  ;;  %v743_v4 = vmax.f32 %v695_v40, %v711_v51  ;;  %v703_v7 = vmax.f32 %v655_v42, %v671_v53 }
 0x102   : > { %v693_v5 = vmax.f32 %v645_v46, %v661_v54  ;;  %v621_v11 = vrot.slane %v1410_v1, 2  ;;  %v1431_v14 = vunpack.c.l.b16 %v1144_v50  ;;  %v759_v15 = vrot.slane %v1375_v41, 5 }
 0x103   : > { %v807_v16 = vrot.slane %v1375_v41, 6  ;;  %v855_v13 = vrot.slane %v1375_v41, 7  ;;  %v962_v44 = vunpack.c.l.b16 %v1134_v52  ;;  %v719_v17 = vrot.slane %v1386_v8, 4 }
 0x104   : > { %v709_v9 = vrot.slane %v1403_v23, 4  ;;  %v653_v26 = vmax.f32 %v605_v55, %v621_v11  ;;  %v1142_v19 = vpack.c.bf16 %v890_v62, %v890_v62  ;;  %v382_v20 = vadd.f32 %v1167_v48, %v1284_v28 }
 0x105   : > { %v414_v21 = vadd.f32 %v1175_v0, %v1284_v28  ;;  %v374_v22 = vadd.f32 %v1284_v28, %v373_v27  ;;  %v791_v29 = vmax.f32 %v743_v4, %v759_v15  ;;  %v751_v30 = vmax.f32 %v703_v7, %v719_v17 }
 0x106   : > { %v741_v31 = vmax.f32 %v693_v5, %v709_v9  ;;  %v669_v59 = vrot.slane %v1410_v1, 3  ;;  %v767_v41 = vrot.slane %v1386_v8, 5  ;;  %v757_v45 = vrot.slane %v1403_v23, 5 }
 0x107   : > { %v424_v32 = vmax.f32 %v382_v20, 0.0  ;;  %v432_v33 = vmax.f32 %v414_v21, 0.0  ;;  %v977_v34 = vrot.slane %v962_v44, 7  ;;  %v422_v12 = vmax.f32 %v374_v22, 0.0 }
 0x108   : > { %v701_v35 = vmax.f32 %v653_v26, %v669_v59  ;;  %v406_v63 = vadd.f32 %v1284_v28, %v405_v25  ;;  %v1445_v36 = vunpack.c.l.b16 %v1142_v19  ;;  %v815_v37 = vrot.slane %v1386_v8, 6 }
 0x109   : > { %v1448_v38 = vmul.f32 %v487_v3, %v424_v32  ;;  %v1450_v60 = vmul.f32 %v527_v57, %v432_v33  ;;  %v839_v40 = vmax.f32 %v791_v29, %v807_v16  ;;  %v799_v42 = vmax.f32 %v751_v30, %v767_v41 }
 0x10a   : > { %v789_v46 = vmax.f32 %v741_v31, %v757_v45  ;;  %v717_v47 = vrot.slane %v1410_v1, 4  ;;  %v863_v48 = vrot.slane %v1386_v8, 7  ;;  %v805_v50 = vrot.slane %v1403_v23, 6 }
 0x10b   : > { %v853_v43 = vrot.slane %v1403_v23, 7  ;;  %v568_v28 = vrot.slane %v1448_v38, 1  ;;  %v1458_v51 = vsel %vm978_vm1, %v977_v34, %v961_v56  ;;  %v1461_v53 = vmul.f32 %v1352_v2, %v422_v12 }
 0x10c   : > { %v749_v52 = vmax.f32 %v701_v35, %v717_v47  ;;  %v430_v54 = vmax.f32 %v406_v63, 0.0  ;;  %v998_v55 = vrot.slane %v1445_v36, 7  ;;  %v616_v0 = vrot.slane %v1448_v38, 2 }
 0x10d   : > { %v600_v62 = vmax.f32 %v1448_v38, %v568_v28  ;;  %v576_v3 = vrot.slane %v1450_v60, 1  ;;  %v1467_v4 = vmax.f32 %v839_v40, %v855_v13  ;;  %v847_v23 = vmax.f32 %v799_v42, %v815_v37 }
 0x10e   : > { %v837_v7 = vmax.f32 %v789_v46, %v805_v50  ;;  %v765_v56 = vrot.slane %v1410_v1, 5  ;;  %v664_v11 = vrot.slane %v1448_v38, 3  ;;  %v624_v27 = vrot.slane %v1450_v60, 2 }
 0x10f   : > { %v648_v5 = vmax.f32 %v600_v62, %v616_v0  ;;  %v608_v2 = vmax.f32 %v1450_v60, %v576_v3  ;;  %v813_v16 = vrot.slane %v1410_v1, 6  ;;  %v566_v44 = vrot.slane %v1461_v53, 1 }
 0x110   : > { %v797_v15 = vmax.f32 %v749_v52, %v765_v56  ;;  %v1476_v13 = vmul.f32 %v1367_v24, %v430_v54  ;;  %v712_v9 = vrot.slane %v1448_v38, 4  ;;  %v672_v19 = vrot.slane %v1450_v60, 3 }
 0x111   : > { %v696_v17 = vmax.f32 %v648_v5, %v664_v11  ;;  %v656_v26 = vmax.f32 %v608_v2, %v624_v27  ;;  %v885_v20 = vmax.f32 %v837_v7, %v853_v43  ;;  %v861_v21 = vrot.slane %v1410_v1, 7 }
 0x112   : > { %v598_v22 = vmax.f32 %v1461_v53, %v566_v44  ;;  %v614_v25 = vrot.slane %v1461_v53, 2  ;;  %v760_v30 = vrot.slane %v1448_v38, 5  ;;  %v720_v24 = vrot.slane %v1450_v60, 4 }
 0x113   : > { %v744_v29 = vmax.f32 %v696_v17, %v712_v9  ;;  %v704_v31 = vmax.f32 %v656_v26, %v672_v19  ;;  %v845_v59 = vmax.f32 %v797_v15, %v813_v16  ;;  %v662_v45 = vrot.slane %v1461_v53, 3 }
 0x114   : > { %v646_v41 = vmax.f32 %v598_v22, %v614_v25  ;;  %v574_v32 = vrot.slane %v1476_v13, 1  ;;  %v808_v1 = vrot.slane %v1448_v38, 6  ;;  %v768_v34 = vrot.slane %v1450_v60, 5 }
 0x115   : > { %v792_v33 = vmax.f32 %v744_v29, %v760_v30  ;;  %v752_v57 = vmax.f32 %v704_v31, %v720_v24  ;;  %v710_v12 = vrot.slane %v1461_v53, 4  ;;  %v622_v36 = vrot.slane %v1476_v13, 2 }
 0x116   : > { %v694_v35 = vmax.f32 %v646_v41, %v662_v45  ;;  %v606_v63 = vmax.f32 %v1476_v13, %v574_v32  ;;  %v856_v40 = vrot.slane %v1448_v38, 7  ;;  %v816_v46 = vrot.slane %v1450_v60, 6 }
 0x117   : > { %v840_v37 = vmax.f32 %v792_v33, %v808_v1  ;;  %v800_v42 = vmax.f32 %v752_v57, %v768_v34  ;;  %v758_v50 = vrot.slane %v1461_v53, 5  ;;  %v670_v28 = vrot.slane %v1476_v13, 3 }
 0x118   : > { %v742_v47 = vmax.f32 %v694_v35, %v710_v12  ;;  %v654_v43 = vmax.f32 %v606_v63, %v622_v36  ;;  %v1137_v52 = vpack.c.bf16 %v885_v20, %v885_v20  ;;  %v893_v54 = vmax.f32 %v845_v59, %v861_v21 }
 0x119   : > { %v806_v62 = vrot.slane %v1461_v53, 6  ;;  %v718_v0 = vrot.slane %v1476_v13, 4  ;;  %v888_v3 = vmax.f32 %v840_v37, %v856_v40  ;;  %v848_v7 = vmax.f32 %v800_v42, %v816_v46 }
 0x11a   : > { %v790_v38 = vmax.f32 %v742_v47, %v758_v50  ;;  %v702_v56 = vmax.f32 %v654_v43, %v670_v28  ;;  %v982_v5 = vsel %vm981_vm2, %v980_v10, %v1458_v51  ;;  %v999_v11 = vsel %vm978_vm1, %v998_v55, %v1427_v58 }
 0x11b   : > { %v1139_v2 = vpack.c.bf16 %v1467_v4, %v1467_v4  ;;  %v864_v27 = vrot.slane %v1450_v60, 7  ;;  %v854_v16 = vrot.slane %v1461_v53, 7  ;;  %v766_v17 = vrot.slane %v1476_v13, 5 }
 0x11c   : > { %v838_v15 = vmax.f32 %v790_v38, %v806_v62  ;;  %v750_v44 = vmax.f32 %v702_v56, %v718_v0  ;;  %v895_v9 = vmax.f32 %v847_v23, %v863_v48  ;;  %v965_v6 = vunpack.c.l.b16 %v1137_v52 }
 0x11d   : > { %v1145_v26 = vpack.c.bf16 %v893_v54, %v893_v54  ;;  %v814_v10 = vrot.slane %v1476_v13, 6  ;;  %v1140_v58 = vpack.c.bf16 %v888_v3, %v888_v3  ;;  %v896_v51 = vmax.f32 %v848_v7, %v864_v27 }
 0x11e   : > { %v886_v55 = vmax.f32 %v838_v15, %v854_v16  ;;  %v798_v60 = vmax.f32 %v750_v44, %v766_v17  ;;  %v1002_v4 = vrot.slane %v1431_v14, 5  ;;  %v985_v53 = vsel %vm984_vm3, %v983_v61, %v982_v5 }
 0x11f   : > { %v1001_v8 = vsel %vm981_vm2, %v1000_v49, %v999_v11  ;;  %v862_v19 = vrot.slane %v1476_v13, 7  ;;  %v967_v20 = vunpack.c.l.b16 %v1139_v2  ;;  %v1147_v21 = vpack.c.bf16 %v895_v9, %v895_v9 }
 0x120   : > { %v1138_v48 = vpack.c.bf16 %v886_v55, %v886_v55  ;;  %v846_v23 = vmax.f32 %v798_v60, %v814_v10  ;;  %v986_v22 = vrot.slane %v965_v6, 4  ;;  %v973_v25 = vunpack.c.l.b16 %v1145_v26 }
 0x121   : > { %v968_v14 = vunpack.c.l.b16 %v1140_v58  ;;  %v1148_v29 = vpack.c.bf16 %v896_v51, %v896_v51  ;;  %v1003_v18 = vsel %vm984_vm3, %v1002_v4, %v1001_v8  ;;  %v992_v31 = vrot.slane %v967_v20, 2 }
 0x122   : > { %v966_v39 = vunpack.c.l.b16 %v1138_v48  ;;  %v894_v30 = vmax.f32 %v846_v23, %v862_v19  ;;  %v975_v24 = vunpack.c.l.b16 %v1147_v21  ;;  %v988_v13 = vsel %vm987_vm4, %v986_v22, %v985_v53 }
 0x123   : > { %v1004_v59 = vrot.slane %v973_v25, 4  ;;  %v995_v41 = vrot.slane %v968_v14, 1  ;;  %v976_v45 = vunpack.c.l.b16 %v1148_v29 }
 0x124   : > { %v989_v61 = vrot.slane %v966_v39, 3  ;;  %v1146_v49 = vpack.c.bf16 %v894_v30, %v894_v30  ;;  %v1008_v35 = vrot.slane %v975_v24, 2 }
 0x125   : > { %v1005_v12 = vsel %vm987_vm4, %v1004_v59, %v1003_v18  ;;  %v1010_v36 = vrot.slane %v976_v45, 1 }
 0x126   : > { %v991_v32 = vsel %vm990_vm5, %v989_v61, %v988_v13  ;;  %v974_v33 = vunpack.c.l.b16 %v1146_v49 }
 0x127   : > { %v994_v1 = vsel %vm993_vm6, %v992_v31, %v991_v32 }
 0x128   : > { %v997_v57 = vsel %vm996_vm7, %v995_v41, %v994_v1  ;;  %v1006_v34 = vrot.slane %v974_v33, 3 }
 0x129   : > { %v1012_v63 = vpack.c.b16 %v997_v57, %v997_v57 }
 0x12a   : > { %v1007_v37 = vsel %vm990_vm5, %v1006_v34, %v1005_v12 }
 0x12b   : > { %1016 = vst [vmem:[%s221_s8] sm:$0xf] %v1012_v63  ;;  %v1009_v40 = vsel %vm993_vm6, %v1008_v35, %v1007_v37 }
 0x12c   : > { %v1011_v42 = vsel %vm996_vm7, %v1010_v36, %v1009_v40 }
 0x12d   : > { %v1013_v46 = vpack.c.b16 %v1011_v42, %v1011_v42 }
 0x12f   : > { %1017 = vst [vmem:[%s221_s8 + $0x4] sm:$0xf] %v1013_v46 }
 0x130 PF: > { %s14_s15 = sadd.s32 1, %s1204_s15  }
 0x131   : > { %p11_p5 = scmp.ge.s32.totalorder %s14_s15, 4  }
 0x133   :  { %13 = sbr.rel (!%p11_p5) target bundleno = 1 (0x1), region = 69 }

// kernel: feature_extractor_forward.3
= control target key start
LH: loop header
LB: loop body
LE: loop exit
PB: predicated region body
PF: predicated region fallthrough
CT: control target
= control target key end

     0   :  { %s3993_s12 = smov 0   ;;  %s4745_s0 = inlined_call_operand.vmem [shape: bf16[2,10,128], index: 0, kind: input, shape index: {}]   ;;  %s4746_s1 = inlined_call_operand.vmem [shape: bf16[3,1024,128], index: 1, kind: input, shape index: {}]   ;;  %s4747_s2 = inlined_call_operand.vmem [shape: f32[3,1,128], index: 2, kind: input, shape index: {}]   ;;  %s4748_s3 = inlined_call_operand.vmem [shape: f32[2,2,128], index: 3, kind: output, shape index: {}]  }
   0x1 LB: > { %s2993_s13 = sadd.s32 4294967295, %s3971_s12   ;;  %p2997_p0 = scmp.ge.s32.totalorder %s3971_s12, 1  ;;  %s3971_s12 = sphi %s3993_s12, %s13_s12  }
   0x2   : > { %p137_p1 = scmp.lt.s32.totalorder %s3971_s12, 3 }
   0x4   : > { %p138_p2 = pnand %p2997_p0, %p137_p1 }
   0x5   : > { %p160_p3 = scmp.lt.s32.totalorder (!%p138_p2), %s2993_s13, 1 }
   0x6   : > { %141 = sbr.rel (%p138_p2) target bundleno = 865 (0x361), region = 32 }
   0xb   : > { %v3773_v0 = vld [vmem:[%s4746_s1 + $0x78] sm:$0xff]   ;;  %v3777_v4 = vld [vmem:[%s4746_s1 + $0x70] sm:$0xff]   ;;  %v3781_v8 = vld [vmem:[%s4746_s1 + $0x68] sm:$0xff]   ;;  %s4770_s13 = smov (!%p160_p3, %s2993_s13), 1  ;;  %vm170_vm0 = vcmask 1041408   ;;  %vm176_vm1 = vcmask 1043458  }
   0xc   : > { %v3774_v1 = vld [vmem:[%s4746_s1 + $0xf8] sm:$0xff]   ;;  %3501 = vmatprep.subr.bf16.mxu0 %v3773_v0  ;;  %v3778_v5 = vld [vmem:[%s4746_s1 + $0xf0] sm:$0xff]   ;;  %v3782_v9 = vld [vmem:[%s4746_s1 + $0xe8] sm:$0xff]   ;;  %s3496_s20 = sshll.u32 %s4770_s13, 3  ;;  %vm171_vm2 = vsmask.f32 1280 }
   0xd   : > { %v3775_v2 = vld [vmem:[%s4746_s1 + $0x38] sm:$0xff]   ;;  %3523 = vmatprep.subr.bf16.mxu1 %v3774_v1  ;;  %v3779_v6 = vld [vmem:[%s4746_s1 + $0x30] sm:$0xff]   ;;  %v3783_v10 = vld [vmem:[%s4746_s1 + $0x28] sm:$0xff]   ;;  %s164_s29 = scalar_lea.vmem %s4745_s0, %s3496_s20  ;;  %vm177_vm3 = vsmask.f32 7946  ;;  %vm212_vm7 = vcmask 1043457  }
   0xe   : > { %v3776_v3 = vld [vmem:[%s4746_s1 + $0xb8] sm:$0xff]   ;;  %3502 = vmatpush3.bf16.msra.mxu0 %v3775_v2  ;;  %v3780_v7 = vld [vmem:[%s4746_s1 + $0xb0] sm:$0xff]   ;;  %v3784_v11 = vld [vmem:[%s4746_s1 + $0xa8] sm:$0xff]   ;;  %vm190_vm6 = vsmask.f32 5392  ;;  %vm218_vm9 = vcmask 1042432  }
   0xf   : > { %3524 = vmatpush3.bf16.msra.mxu1 %v3776_v3  ;;  %3503 = vmatprep.subr.bf16.mxu0 %v3777_v4  ;;  %v3785_v12 = vld [vmem:[%s4746_s1 + $0x60] sm:$0xff]   ;;  %v3789_v16 = vld [vmem:[%s4746_s1 + $0x58] sm:$0xff]   ;;  %v3793_v20 = vld [vmem:[%s4746_s1 + $0x50] sm:$0xff]   ;;  %vm213_vm8 = vsmask.f32 7942  ;;  %vm260_vm14 = vcmask 1046532  }
  0x10   : > { %3525 = vmatprep.subr.bf16.mxu1 %v3778_v5  ;;  %v3786_v13 = vld [vmem:[%s4746_s1 + $0xe0] sm:$0xff]   ;;  %v3790_v17 = vld [vmem:[%s4746_s1 + $0xd8] sm:$0xff]   ;;  %v3794_v21 = vld [vmem:[%s4746_s1 + $0xd0] sm:$0xff]   ;;  %vm219_vm10 = vsmask.f32 2304  ;;  %s3000_s6 = sshll.u32 %s4770_s13, 1 }
  0x11   : > { %v3787_v14 = vld [vmem:[%s4746_s1 + $0x20] sm:$0xff]   ;;  %v3791_v18 = vld [vmem:[%s4746_s1 + $0x18] sm:$0xff]   ;;  %v3795_v22 = vld [vmem:[%s4746_s1 + $0x10] sm:$0xff]   ;;  %vm230_vm15 = vsmask.f32 3328  ;;  %s168_s9 = scalar_lea.vmem %s4748_s3, %s3000_s6 }
  0x12   : > { %3504 = vmatpush3.bf16.msra.mxu0 %v3779_v6  ;;  %v3788_v15 = vld [vmem:[%s4746_s1 + $0xa0] sm:$0xff]   ;;  %v3792_v19 = vld [vmem:[%s4746_s1 + $0x98] sm:$0xff]   ;;  %v3796_v23 = vld [vmem:[%s4746_s1 + $0x90] sm:$0xff]  }
  0x13   : > { %3526 = vmatpush3.bf16.msra.mxu1 %v3780_v7  ;;  %3505 = vmatprep.subr.bf16.mxu0 %v3781_v8  ;;  %v3797_v24 = vld [vmem:[%s4746_s1 + $0x48] sm:$0xff]   ;;  %v3801_v28 = vld [vmem:[%s4746_s1 + $0x40] sm:$0xff]   ;;  %vm172_vm4 = vmand %vm170_vm0, %vm171_vm2 }
  0x14   : > { %3527 = vmatprep.subr.bf16.mxu1 %v3782_v9  ;;  %v3798_v25 = vld [vmem:[%s4746_s1 + $0xc8] sm:$0xff]   ;;  %v3802_v29 = vld [vmem:[%s4746_s1 + $0xc0] sm:$0xff]   ;;  %vm178_vm5 = vmand %vm176_vm1, %vm177_vm3  ;;  %vm231_vm1 = vsmask.f32 7440 }
  0x15   : > { %v3799_v26 = vld [vmem:[%s4746_s1 + $0x8] sm:$0xff]   ;;  %v3803_v30 = vld [vmem:[%s4746_s1] sm:$0xff]   ;;  %v3805_v39 = vld [vmem:[%s4746_s1 + $0x178] sm:$0xff]  }
  0x16   : > { %3506 = vmatpush3.bf16.msra.mxu0 %v3783_v10  ;;  %v3800_v27 = vld [vmem:[%s4746_s1 + $0x88] sm:$0xff]   ;;  %v3804_v31 = vld [vmem:[%s4746_s1 + $0x80] sm:$0xff]   ;;  %v3806_v43 = vld [vmem:[%s4746_s1 + $0x1f8] sm:$0xff]  }
  0x17   : > { %3528 = vmatpush3.bf16.msra.mxu1 %v3784_v11  ;;  %3507 = vmatprep.subr.bf16.mxu0 %v3785_v12  ;;  %v173_v32 = vld [vmem:[#allocation2] sm:$0x3]  ;;  %v179_v33 = vld [vmem:[#allocation2 + $0x4] sm:$0xc]  ;;  %v189_v36 = vld [vmem:[%s164_s29 + $0x4] sm:$0x1] }
  0x18   : > { %3529 = vmatprep.subr.bf16.mxu1 %v3786_v13  ;;  %v188_v34 = vld [vmem:[%s164_s29] sm:$0xf]  ;;  %v174_v35 = vsel %vm172_vm4, 0, %v173_v32  ;;  %v180_v40 = vsel %vm178_vm5, 0, %v179_v33  ;;  %v202_v41 = vshrl.u32 %v189_v36, 16  ;;  %v205_v42 = vshll.u32 %v189_v36, 16  ;;  %vm4116_vm11 = vmor %vm171_vm2, %vm190_vm6 }
  0x19   : > { %v193_v37 = vshrl.u32 %v188_v34, 16  ;;  %v196_v38 = vshll.u32 %v188_v34, 16  ;;  %175 = vst [vmem:[#allocation2] sm:$0x3] %v174_v35  ;;  %181 = vst [vmem:[#allocation2 + $0x4] sm:$0xc] %v180_v40 }
  0x1a   : > { %3508 = vmatpush3.bf16.msra.mxu0 %v3787_v14  ;;  %v204_v46 = vrot.slane %v202_v41, 6  ;;  %v207_v47 = vrot.slane %v205_v42, 7  ;;  %vm4120_vm12 = vmand %vm212_vm7, %vm213_vm8  ;;  %vm273_vm2 = vsmask.f32 6416  ;;  %vm183_vm6 = vsmask.f32 256 }
  0x1b   : > { %3530 = vmatpush3.bf16.msra.mxu1 %v3788_v15  ;;  %3509 = vmatprep.subr.bf16.mxu0 %v3789_v16  ;;  %v195_v44 = vrot.slane %v193_v37, 6  ;;  %v198_v45 = vrot.slane %v196_v38, 7  ;;  %vm4126_vm13 = vmand %vm218_vm9, %vm219_vm10  ;;  %v3807_v40 = vld [vmem:[%s4746_s1 + $0x138] sm:$0xff]   ;;  %v3809_v41 = vld [vmem:[%s4746_s1 + $0x170] sm:$0xff]   ;;  %vm302_vm7 = vcmask 1045508   ;;  %vm182_vm8 = vcmask 1040384  }
  0x1c   : > { %3531 = vmatprep.subr.bf16.mxu1 %v3790_v17  ;;  %v208_v50 = vor.u32 %v207_v47, %v204_v46  ;;  %vm4138_vm3 = vmor %vm218_vm9, %vm260_vm14  ;;  %vm342_vm9 = vcmask 1044484   ;;  %vm356_vm14 = vsmask.f32 4368 }
  0x1d   : > { %v199_v48 = vor.u32 %v198_v45, %v195_v44  ;;  %vm4146_vm4 = vmor %vm230_vm15, %vm231_vm1  ;;  %v3810_v45 = vld [vmem:[%s4746_s1 + $0x1f0] sm:$0xff]  }
  0x1e   : > { %3510 = vmatpush3.bf16.msra.mxu0 %v3791_v18  ;;  %vm4154_vm5 = vmor %vm219_vm10, %vm273_vm2 }
  0x1f   : > { %3532 = vmatpush3.bf16.msra.mxu1 %v3792_v19  ;;  %3511 = vmatprep.subr.bf16.mxu0 %v3793_v20  ;;  %v200_v51 = vrot.slane %v199_v48, 4  ;;  %vm4188_vm10 = vmor %vm170_vm0, %vm302_vm7 }
  0x20   : > { %3533 = vmatprep.subr.bf16.mxu1 %v3794_v21  ;;  %v215_v55 = vld [vmem:[#allocation2] sm:$0xe]  ;;  %v221_v57 = vld [vmem:[#allocation2 + $0x4] sm:$0x7]  ;;  %vm4203_vm0 = vmand %vm182_vm8, %vm183_vm6 }
  0x21   : > { %v209_v54 = vsel %vm4116_vm11, %v200_v51, %v208_v50  ;;  %v216_v56 = vsel %vm4120_vm12, %v199_v48, %v215_v55  ;;  %v3811_v48 = vld [vmem:[%s4746_s1 + $0x130] sm:$0xff]   ;;  %v3813_v50 = vld [vmem:[%s4746_s1 + $0x168] sm:$0xff]   ;;  %vm4219_vm15 = vmor %vm182_vm8, %vm342_vm9 }
  0x22   : > { %3512 = vmatpush3.bf16.msra.mxu0 %v3795_v22  ;;  %217 = vst [vmem:[#allocation2] sm:$0xe] %v216_v56  ;;  %v222_v58 = vsel %vm4126_vm13, %v209_v54, %v221_v57  ;;  %v3812_v51 = vld [vmem:[%s4746_s1 + $0x1b0] sm:$0xff]   ;;  %v3814_v54 = vld [vmem:[%s4746_s1 + $0x1e8] sm:$0xff]   ;;  %vm4239_vm1 = vmor %vm183_vm6, %vm356_vm14 }
  0x23   : > { %3534 = vmatpush3.bf16.msra.mxu1 %v3796_v23  ;;  %3513 = vmatprep.subr.bf16.mxu0 %v3797_v24  ;;  %223 = vst [vmem:[#allocation2 + $0x4] sm:$0x7] %v222_v58  ;;  %v3815_v55 = vld [vmem:[%s4746_s1 + $0x128] sm:$0xff]   ;;  %v3817_v58 = vld [vmem:[%s4746_s1 + $0x160] sm:$0xff]  }
  0x24   : > { %3535 = vmatprep.subr.bf16.mxu1 %v3798_v25 }
  0x26   : > { %3514 = vmatpush3.bf16.msra.mxu0 %v3799_v26 }
  0x27   : > { %3536 = vmatpush3.bf16.msra.mxu1 %v3800_v27  ;;  %3515 = vmatprep.subr.bf16.mxu0 %v3801_v28 }
  0x28   : > { %3537 = vmatprep.subr.bf16.mxu1 %v3802_v29 }
  0x29   : > { %v224_v59 = vld [vmem:[#allocation2] sm:$0xf] }
  0x2a   : > { %3516 = vmatpush3.bf16.msra.mxu0 %v3803_v30  ;;  %v228_v60 = vld [vmem:[#allocation2] sm:$0xf]  ;;  %v225_v62 = vld [vmem:[#allocation2 + $0x4] sm:$0x1]  ;;  %226 = vst [vmem:[#allocation3] sm:$0xf] %v224_v59 }
  0x2b   : > { %3538 = vmatpush3.bf16.msra.mxu1 %v3804_v31  ;;  %3545 = vmatprep.subr.bf16.mxu0 %v3805_v39  ;;  %v256_v61 = vld [vmem:[#allocation2] sm:$0xe]  ;;  %v229_v63 = vld [vmem:[#allocation2 + $0x4] sm:$0x3]  ;;  %v234_v0 = vshrl.u32 %v228_v60, 16  ;;  %v237_v1 = vshll.u32 %v228_v60, 16 }
  0x2c   : > { %3567 = vmatprep.subr.bf16.mxu1 %v3806_v43  ;;  %227 = vst [vmem:[#allocation3 + $0x20] sm:$0x1] %v225_v62  ;;  %v243_v2 = vshll.u32 %v229_v63, 16  ;;  %v247_v3 = vshrl.u32 %v229_v63, 16  ;;  %v257_v4 = vld [vmem:[#allocation2 + $0x4] sm:$0x3] }
  0x2d   : > { %v3001_v6 = vrot.slane %v256_v61, 9  ;;  %v236_v7 = vrot.slane %v234_v0, 4  ;;  %v239_v8 = vrot.slane %v237_v1, 5  ;;  %v264_v9 = vrot.slane %v257_v4, 5  ;;  %v271_v10 = vld [vmem:[#allocation2] sm:$0xe] }
  0x2e   : > { %v245_v11 = vrot.slane %v243_v2, 5  ;;  %v249_v12 = vrot.slane %v247_v3, 4  ;;  %v272_v13 = vld [vmem:[#allocation2 + $0x4] sm:$0x7]  ;;  %v276_v14 = vshrl.u32 %v271_v10, 16  ;;  %v279_v15 = vshll.u32 %v271_v10, 16 }
  0x2f   : > { %v240_v16 = vor.u32 %v239_v8, %v236_v7  ;;  %v265_v17 = vsel %vm4138_vm3, %v3001_v6, %v264_v9  ;;  %v266_v18 = vrot.slane %v264_v9, 4  ;;  %v285_v19 = vshrl.u32 %v272_v13, 16  ;;  %v3808_v43 = vld [vmem:[%s4746_s1 + $0x1b8] sm:$0xff]   ;;  %v298_v56 = vld [vmem:[#allocation2] sm:$0xc]  ;;  %v3816_v62 = vld [vmem:[%s4746_s1 + $0x1a8] sm:$0xff]  }
  0x30   : > { %v250_v21 = vor.u32 %v249_v12, %v245_v11  ;;  %269 = vst [vmem:[#allocation3 + $0x8] sm:$0xf] %v265_v17  ;;  %v278_v22 = vrot.slane %v276_v14, 5  ;;  %v281_v23 = vrot.slane %v279_v15, 6  ;;  %v288_v24 = vshll.u32 %v272_v13, 16  ;;  %v3819_v63 = vld [vmem:[%s4746_s1 + $0x120] sm:$0xff]  }
  0x31   : > { %v241_v25 = vrot.slane %v240_v16, 4  ;;  %270 = vst [vmem:[#allocation3 + $0x28] sm:$0x1] %v266_v18  ;;  %v287_v26 = vrot.slane %v285_v19, 5  ;;  %v299_v59 = vld [vmem:[#allocation2 + $0x4] sm:$0x7] }
  0x32   : > { %v251_v27 = vrot.slane %v250_v21, 4  ;;  %v282_v28 = vor.u32 %v281_v23, %v278_v22  ;;  %v290_v29 = vrot.slane %v288_v24, 6  ;;  %v3002_v60 = vrot.slane %v298_v56, 10  ;;  %v313_v61 = vld [vmem:[#allocation2] sm:$0xc]  ;;  %v3831_v56 = vld [vmem:[%s4746_s1 + $0x108] sm:$0xff]  }
  0x33   : > { %v246_v30 = vsel %vm4146_vm4, %v241_v25, %v245_v11  ;;  %v306_v0 = vrot.slane %v299_v59, 6  ;;  %v314_v1 = vld [vmem:[#allocation2 + $0x4] sm:$0xf]  ;;  %v316_v2 = vshrl.u32 %v313_v61, 16  ;;  %v319_v3 = vshll.u32 %v313_v61, 16  ;;  %v3821_v11 = vld [vmem:[%s4746_s1 + $0x158] sm:$0xff]  }
  0x34   : > { %254 = vst [vmem:[#allocation3 + $0x4] sm:$0xf] %v246_v30  ;;  %255 = vst [vmem:[#allocation3 + $0x24] sm:$0x1] %v251_v27  ;;  %v283_v32 = vrot.slane %v282_v28, 4  ;;  %v291_v33 = vor.u32 %v290_v29, %v287_v26  ;;  %v3818_v6 = vld [vmem:[%s4746_s1 + $0x1e0] sm:$0xff]  }
  0x35   : > { %v325_v7 = vshrl.u32 %v314_v1, 16  ;;  %v328_v8 = vshll.u32 %v314_v1, 16  ;;  %v185_v9 = vld [vmem:[#allocation2 + $0x8] sm:$0x1]  ;;  %v338_v10 = vld [vmem:[#allocation2] sm:$0x8]  ;;  %v307_v12 = vsel %vm4188_vm10, %v3002_v60, %v306_v0 }
  0x36   : > { %v292_v34 = vsel %vm4154_vm5, %v283_v32, %v291_v33  ;;  %v293_v35 = vrot.slane %v291_v33, 4  ;;  %v308_v13 = vrot.slane %v306_v0, 4  ;;  %v318_v14 = vrot.slane %v316_v2, 6  ;;  %v339_v16 = vld [vmem:[#allocation2 + $0x4] sm:$0xf]  ;;  %v3823_v25 = vld [vmem:[%s4746_s1 + $0x118] sm:$0xff]  }
  0x37   : > { %296 = vst [vmem:[#allocation3 + $0xc] sm:$0xf] %v292_v34  ;;  %v321_v15 = vrot.slane %v319_v3, 7  ;;  %311 = vst [vmem:[#allocation3 + $0x10] sm:$0xf] %v307_v12  ;;  %v327_v17 = vrot.slane %v325_v7, 6 }
  0x38   : > { %297 = vst [vmem:[#allocation3 + $0x2c] sm:$0x1] %v293_v35  ;;  %v330_v18 = vrot.slane %v328_v8, 7  ;;  %v186_v19 = vsel %vm4203_vm0, 0, %v185_v9  ;;  %v3003_v22 = vrot.slane %v338_v10, 11  ;;  %v3820_v24 = vld [vmem:[%s4746_s1 + $0x1a0] sm:$0xff]  }
  0x39   : > { %v353_v23 = vld [vmem:[#allocation2] sm:$0x8]  ;;  %312 = vst [vmem:[#allocation3 + $0x30] sm:$0x1] %v308_v13  ;;  %v322_v26 = vor.u32 %v321_v15, %v318_v14  ;;  %187 = vst [vmem:[#allocation2 + $0x8] sm:$0x1] %v186_v19 }
  0x3a   : > { %v346_v27 = vrot.slane %v339_v16, 7  ;;  %v354_v28 = vld [vmem:[#allocation2 + $0x4] sm:$0xf]  ;;  %v359_v29 = vshrl.u32 %v353_v23, 16  ;;  %v3822_v30 = vld [vmem:[%s4746_s1 + $0x1d8] sm:$0xff]   ;;  %v331_v32 = vor.u32 %v330_v18, %v327_v17  ;;  %v3825_v35 = vld [vmem:[%s4746_s1 + $0x150] sm:$0xff]  }
  0x3b   : > { %v380_v36 = vld [vmem:[#allocation3] sm:$0xff]  ;;  %v364_v33 = vshrl.u32 %v354_v28, 16  ;;  %v367_v34 = vshll.u32 %v354_v28, 16  ;;  %v3833_v60 = vld [vmem:[%s4746_s1 + $0x140] sm:$0xff]   ;;  %v3838_v12 = vld [vmem:[%s4746_s1 + $0x2f8] sm:$0xff]  }
  0x3c   : > { %v384_v37 = vld [vmem:[#allocation3 + $0x20] sm:$0x11]  ;;  %v3834_v2 = vld [vmem:[%s4746_s1 + $0x1c0] sm:$0xff]   ;;  %v3839_v13 = vld [vmem:[%s4746_s1 + $0x238] sm:$0xff]  }
  0x3d   : > { %v3007_v38 = vcombine.high %v380_v36, %v384_v37  ;;  %v3006_v39 = vcombine.low %v380_v36, %v384_v37  ;;  %v323_v36 = vrot.slane %v322_v26, 4  ;;  %v347_v37 = vsel %vm4219_vm15, %v3003_v22, %v346_v27  ;;  %v3830_v59 = vld [vmem:[%s4746_s1 + $0x1c8] sm:$0xff]   ;;  %v3840_v14 = vld [vmem:[%s4746_s1 + $0x2b8] sm:$0xff]   ;;  %v3841_v15 = vld [vmem:[%s4746_s1 + $0x270] sm:$0xff]  }
  0x3e   : > { %v381_v42 = vld [vmem:[#allocation3 + $0x8] sm:$0xff]  ;;  %351 = vst [vmem:[#allocation3 + $0x18] sm:$0xf] %v347_v37  ;;  %v3845_v19 = vld [vmem:[%s4746_s1 + $0x268] sm:$0xff]   ;;  %v3850_v26 = vld [vmem:[%s4746_s1 + $0x2e0] sm:$0xff]  }
  0x3f   : > { %979 = vmatprep.mubr.bf16.mxu0 %v3007_v38  ;;  %v385_v44 = vld [vmem:[#allocation3 + $0x28] sm:$0x11]  ;;  %v348_v38 = vrot.slane %v346_v27, 4  ;;  %v3846_v22 = vld [vmem:[%s4746_s1 + $0x2e8] sm:$0xff]   ;;  %v3851_v27 = vld [vmem:[%s4746_s1 + $0x220] sm:$0xff]  }
  0x40   : > { %980 = vmatmul.mubr.bf16.vlgmr.msra.gmra.mxu0 %v3006_v39  ;;  %v3009_v46 = vcombine.high %v381_v42, %v385_v44  ;;  %v3008_v47 = vcombine.low %v381_v42, %v385_v44  ;;  %v3004_v39 = vrot.slane %v359_v29, 11  ;;  %v366_v42 = vrot.slane %v364_v33, 7  ;;  %v3827_v44 = vld [vmem:[%s4746_s1 + $0x110] sm:$0xff]   ;;  %v3847_v23 = vld [vmem:[%s4746_s1 + $0x228] sm:$0xff]   ;;  %v3852_v28 = vld [vmem:[%s4746_s1 + $0x2a0] sm:$0xff]  }
  0x41   : > { %3546 = vmatpush3.bf16.msra.mxu0 %v3807_v40  ;;  %v333_v40 = vrot.slane %v331_v32, 4  ;;  %352 = vst [vmem:[#allocation3 + $0x38] sm:$0x1] %v348_v38  ;;  %v3842_v16 = vld [vmem:[%s4746_s1 + $0x2f0] sm:$0xff]   ;;  %v3853_v29 = vld [vmem:[%s4746_s1 + $0x258] sm:$0xff]   ;;  %v3861_v38 = vld [vmem:[%s4746_s1 + $0x248] sm:$0xff]  }
  0x42   : > { %3547 = vmatprep.subr.bf16.mxu0 %v3809_v41  ;;  %1020 = vmatprep.mubr.bf16.mxu1 %v3009_v46  ;;  %v3826_v46 = vld [vmem:[%s4746_s1 + $0x1d0] sm:$0xff]   ;;  %v3856_v33 = vld [vmem:[%s4746_s1 + $0x298] sm:$0xff]  }
  0x43   : > { %1021 = vmatmul.mubr.bf16.vlgmr.msra.gmra.mxu1 %v3008_v47  ;;  %v3829_v47 = vld [vmem:[%s4746_s1 + $0x148] sm:$0xff]   ;;  %337 = vst [vmem:[#allocation3 + $0x34] sm:$0x1] %v333_v40  ;;  %v3843_v17 = vld [vmem:[%s4746_s1 + $0x230] sm:$0xff]  }
  0x44   : > { %3568 = vmatpush3.bf16.msra.mxu1 %v3808_v43  ;;  %v3824_v43 = vld [vmem:[%s4746_s1 + $0x198] sm:$0xff]   ;;  %v3844_v18 = vld [vmem:[%s4746_s1 + $0x2b0] sm:$0xff]   ;;  %v3863_v40 = vld [vmem:[%s4746_s1 + $0x208] sm:$0xff]  }
  0x45   : > { %3548 = vmatpush3.bf16.msra.mxu0 %v3811_v48  ;;  %3569 = vmatprep.subr.bf16.mxu1 %v3810_v45  ;;  %v332_v45 = vsel %vm4116_vm11, %v323_v36, %v331_v32  ;;  %v369_v48 = vor.u32 %v367_v34, %v366_v42  ;;  %v3855_v32 = vld [vmem:[%s4746_s1 + $0x218] sm:$0xff]   ;;  %v3857_v34 = vld [vmem:[%s4746_s1 + $0x250] sm:$0xff]  }
  0x46   : > { %3549 = vmatprep.subr.bf16.mxu0 %v3813_v50  ;;  %336 = vst [vmem:[#allocation3 + $0x14] sm:$0xf] %v332_v45  ;;  %v371_v50 = vrot.slane %v366_v42, 4  ;;  %v3859_v36 = vld [vmem:[%s4746_s1 + $0x210] sm:$0xff]   ;;  %v3864_v42 = vld [vmem:[%s4746_s1 + $0x288] sm:$0xff]   ;;  %v3867_v45 = vld [vmem:[%s4746_s1 + $0x200] sm:$0xff]  }
  0x47   : > { %v3860_v37 = vld [vmem:[%s4746_s1 + $0x290] sm:$0xff]  }
  0x48   : > { %3570 = vmatpush3.bf16.msra.mxu1 %v3812_v51  ;;  %v355_v51 = vld [vmem:[#allocation2 + $0x8] sm:$0x1]  ;;  %v3937_v41 = vld [vmem:[%s4746_s1 + $0x570] sm:$0xff]  }
  0x49   : > { %3550 = vmatpush3.bf16.msra.mxu0 %v3815_v55  ;;  %3571 = vmatprep.subr.bf16.mxu1 %v3814_v54  ;;  %v370_v54 = vsel %vm4239_vm1, %v3004_v39, %v369_v48  ;;  %v3828_v55 = vld [vmem:[%s4746_s1 + $0x190] sm:$0xff]   ;;  %v3862_v39 = vld [vmem:[%s4746_s1 + $0x2c8] sm:$0xff]   ;;  %v3870_v48 = vld [vmem:[%s4746_s1 + $0x3f8] sm:$0xff]  }
  0x4a   : > { %3551 = vmatprep.subr.bf16.mxu0 %v3817_v58  ;;  %v373_v58 = vshll.u32 %v355_v51, 16  ;;  %378 = vst [vmem:[#allocation3 + $0x1c] sm:$0xf] %v370_v54  ;;  %v386_v1 = vld [vmem:[#allocation3 + $0x30] sm:$0x11] }
  0x4c   : > { %3572 = vmatpush3.bf16.msra.mxu1 %v3816_v62  ;;  %v375_v61 = vsel %vm4239_vm1, %v371_v50, %v373_v58  ;;  %v3832_v62 = vld [vmem:[%s4746_s1 + $0x188] sm:$0xff]  }
  0x4d   : > { %3552 = vmatpush3.bf16.msra.mxu0 %v3819_v63  ;;  %3573 = vmatprep.subr.bf16.mxu1 %v3818_v6  ;;  %379 = vst [vmem:[#allocation3 + $0x3c] sm:$0x1] %v375_v61  ;;  %v3835_v63 = vld [vmem:[%s4746_s1 + $0x100] sm:$0xff]  }
  0x4e   : > { %3553 = vmatprep.subr.bf16.mxu0 %v3821_v11  ;;  %v382_v0 = vld [vmem:[#allocation3 + $0x10] sm:$0xff] }
  0x4f   : > { %v3011_v3 = vcombine.high %v382_v0, %v386_v1  ;;  %v3836_v6 = vld [vmem:[%s4746_s1 + $0x180] sm:$0xff]   ;;  %v3010_v7 = vcombine.low %v382_v0, %v386_v1  ;;  %v3837_v11 = vld [vmem:[%s4746_s1 + $0x278] sm:$0xff]  }
  0x50   : > { %3574 = vmatpush3.bf16.msra.mxu1 %v3820_v24  ;;  %v3848_v24 = vld [vmem:[%s4746_s1 + $0x2a8] sm:$0xff]  }
  0x51   : > { %3554 = vmatpush3.bf16.msra.mxu0 %v3823_v25  ;;  %3575 = vmatprep.subr.bf16.mxu1 %v3822_v30  ;;  %v383_v4 = vld [vmem:[#allocation3 + $0x18] sm:$0xff]  ;;  %v3854_v30 = vld [vmem:[%s4746_s1 + $0x2d8] sm:$0xff]  }
  0x52   : > { %3555 = vmatprep.subr.bf16.mxu0 %v3825_v35  ;;  %1061 = vmatprep.mubr.bf16.mxu0 %v3011_v3  ;;  %v3849_v25 = vld [vmem:[%s4746_s1 + $0x260] sm:$0xff]   ;;  %v3858_v35 = vld [vmem:[%s4746_s1 + $0x2d0] sm:$0xff]  }
  0x54   : > { %3576 = vmatpush3.bf16.msra.mxu1 %v3824_v43  ;;  %v387_v8 = vld [vmem:[#allocation3 + $0x38] sm:$0x11] }
  0x55   : > { %3556 = vmatpush3.bf16.msra.mxu0 %v3827_v44  ;;  %3577 = vmatprep.subr.bf16.mxu1 %v3826_v46  ;;  %v3013_v9 = vcombine.high %v383_v4, %v387_v8  ;;  %v3012_v10 = vcombine.low %v383_v4, %v387_v8  ;;  %v3865_v43 = vld [vmem:[%s4746_s1 + $0x240] sm:$0xff]  }
  0x56   : > { %3557 = vmatprep.subr.bf16.mxu0 %v3829_v47  ;;  %v3866_v44 = vld [vmem:[%s4746_s1 + $0x2c0] sm:$0xff]   ;;  %v3869_v47 = vld [vmem:[%s4746_s1 + $0x378] sm:$0xff]  }
  0x57   : > { %1102 = vmatprep.mubr.bf16.mxu1 %v3013_v9  ;;  %v3868_v46 = vld [vmem:[%s4746_s1 + $0x280] sm:$0xff]  }
  0x58   : > { %3578 = vmatpush3.bf16.msra.mxu1 %v3828_v55 }
  0x59   : > { %3558 = vmatpush3.bf16.msra.mxu0 %v3831_v56  ;;  %3579 = vmatprep.subr.bf16.mxu1 %v3830_v59  ;;  %v3005_v59 = vld [vmem:[%s4747_s2] ss:$0 sm:$0xff] }
  0x5a   : > { %3559 = vmatprep.subr.bf16.mxu0 %v3833_v60 }
  0x5c   : > { %3580 = vmatpush3.bf16.msra.mxu1 %v3832_v62 }
  0x5d   : > { %3560 = vmatpush3.bf16.msra.mxu0 %v3835_v63  ;;  %3581 = vmatprep.subr.bf16.mxu1 %v3834_v2 }
  0x5e   : > { %3589 = vmatprep.subr.bf16.mxu0 %v3837_v11 }
  0x60   : > { %1062 = vmatmul.mubr.bf16.vlgmr.msra.gmra.mxu0 %v3010_v7  ;;  %3582 = vmatpush3.bf16.msra.mxu1 %v3836_v6 }
  0x61   : > { %3611 = vmatprep.subr.bf16.mxu1 %v3838_v12  ;;  %3590 = vmatpush3.bf16.msra.mxu0 %v3839_v13 }
  0x62   : > { %3591 = vmatprep.subr.bf16.mxu0 %v3841_v15 }
  0x63   : > { %1103 = vmatmul.mubr.bf16.vlgmr.msra.gmra.mxu1 %v3012_v10 }
  0x64   : > { %3612 = vmatpush3.bf16.msra.mxu1 %v3840_v14 }
  0x65   : > { %3613 = vmatprep.subr.bf16.mxu1 %v3842_v16  ;;  %3592 = vmatpush3.bf16.msra.mxu0 %v3843_v17 }
  0x66   : > { %3593 = vmatprep.subr.bf16.mxu0 %v3845_v19 }
  0x68   : > { %3614 = vmatpush3.bf16.msra.mxu1 %v3844_v18 }
  0x69   : > { %3615 = vmatprep.subr.bf16.mxu1 %v3846_v22  ;;  %3594 = vmatpush3.bf16.msra.mxu0 %v3847_v23 }
  0x6a   : > { %3595 = vmatprep.subr.bf16.mxu0 %v3849_v25 }
  0x6c   : > { %3616 = vmatpush3.bf16.msra.mxu1 %v3848_v24 }
  0x6d   : > { %3617 = vmatprep.subr.bf16.mxu1 %v3850_v26  ;;  %3596 = vmatpush3.bf16.msra.mxu0 %v3851_v27 }
  0x6e   : > { %3597 = vmatprep.subr.bf16.mxu0 %v3853_v29 }
  0x70   : > { %3618 = vmatpush3.bf16.msra.mxu1 %v3852_v28 }
  0x71   : > { %3619 = vmatprep.subr.bf16.mxu1 %v3854_v30  ;;  %3598 = vmatpush3.bf16.msra.mxu0 %v3855_v32 }
  0x72   : > { %3599 = vmatprep.subr.bf16.mxu0 %v3857_v34  ;;  %v1139_v34 = vld [vmem:[#allocation2] sm:$0xe] }
  0x74   : > { %3620 = vmatpush3.bf16.msra.mxu1 %v3856_v33 }
  0x75   : > { %3621 = vmatprep.subr.bf16.mxu1 %v3858_v35  ;;  %3600 = vmatpush3.bf16.msra.mxu0 %v3859_v36 }
  0x76   : > { %3601 = vmatprep.subr.bf16.mxu0 %v3861_v38 }
  0x78   : > { %3622 = vmatpush3.bf16.msra.mxu1 %v3860_v37 }
  0x79   : > { %3623 = vmatprep.subr.bf16.mxu1 %v3862_v39  ;;  %3602 = vmatpush3.bf16.msra.mxu0 %v3863_v40 }
  0x7a   : > { %3603 = vmatprep.subr.bf16.mxu0 %v3865_v43 }
  0x7c   : > { %3624 = vmatpush3.bf16.msra.mxu1 %v3864_v42 }
  0x7d   : > { %3625 = vmatprep.subr.bf16.mxu1 %v3866_v44  ;;  %3604 = vmatpush3.bf16.msra.mxu0 %v3867_v45  ;;  %v1142_v44 = vld [vmem:[#allocation2 + $0x4] sm:$0x7] }
  0x7e   : > { %3633 = vmatprep.subr.bf16.mxu0 %v3869_v47 }
  0x80   : > { %3626 = vmatpush3.bf16.msra.mxu1 %v3868_v46 }
  0x81   : > { %3655 = vmatprep.subr.bf16.mxu1 %v3870_v48 }
 0x100   : > { %v3517_v50 = vpop.f32.mrf.mxu0 }
 0x102   : > { %v3518_v51 = vpop.f32.mrf.mxu0 }
 0x103   : > { %v3539_v54 = vpop.f32.mrf.mxu1  ;;  %v3519_v58 = vadd.f32 %v3518_v51, %v3517_v50 }
 0x104   : > { %v3520_v55 = vpop.f32.mrf.mxu0 }
 0x105   : > { %v3540_v56 = vpop.f32.mrf.mxu1  ;;  %v982_v62 = vadd.f32 %v3519_v58, %v3005_v59 }
 0x106   : > { %v3521_v60 = vpop.f32.mrf.mxu0  ;;  %v3541_v1 = vadd.f32 %v3540_v56, %v3539_v54 }
 0x107   : > { %v3542_v61 = vpop.f32.mrf.mxu1  ;;  %v3522_v63 = vadd.f32 %v3521_v60, %v3520_v55 }
 0x108   : > { %v1023_v4 = vadd.f32 %v3541_v1, %v982_v62 }
 0x109   : > { %v3543_v2 = vpop.f32.mrf.mxu1  ;;  %v985_v6 = vadd.f32 %v3522_v63, %v3005_v59 }
 0x10a   : > { %v3544_v10 = vadd.f32 %v3543_v2, %v3542_v61 }
 0x10c   : > { %v1026_v14 = vadd.f32 %v3544_v10, %v985_v6 }
 0x120   : > { %v3561_v0 = vpop.f32.mrf.mxu0 }
 0x122   : > { %v3562_v3 = vpop.f32.mrf.mxu0 }
 0x123   : > { %v3563_v7 = vadd.f32 %v3562_v3, %v3561_v0  ;;  %v3583_v8 = vpop.f32.mrf.mxu1 }
 0x124   : > { %v3564_v9 = vpop.f32.mrf.mxu0 }
 0x125   : > { %v1064_v11 = vadd.f32 %v3563_v7, %v1023_v4  ;;  %v3584_v12 = vpop.f32.mrf.mxu1 }
 0x126   : > { %v3565_v13 = vpop.f32.mrf.mxu0  ;;  %v3585_v15 = vadd.f32 %v3584_v12, %v3583_v8 }
 0x127   : > { %v3566_v16 = vadd.f32 %v3565_v13, %v3564_v9  ;;  %v3586_v17 = vpop.f32.mrf.mxu1 }
 0x128   : > { %v1105_v18 = vadd.f32 %v3585_v15, %v1064_v11 }
 0x129   : > { %v1067_v19 = vadd.f32 %v3566_v16, %v1026_v14  ;;  %v3587_v22 = vpop.f32.mrf.mxu1 }
 0x12a   : > { %v1111_v23 = vmax.f32 %v1105_v18, 0.0  ;;  %v3588_v24 = vadd.f32 %v3587_v22, %v3586_v17 }
 0x12c   : > { %v3497_v25 = vpack.c.bf16 %v1111_v23, %v1111_v23  ;;  %v1108_v26 = vadd.f32 %v3588_v24, %v1067_v19 }
 0x12e   : > { %v1120_v27 = vshrl.u32 %v3497_v25, 16  ;;  %v1123_v28 = vshll.u32 %v3497_v25, 16  ;;  %v1112_v29 = vmax.f32 %v1108_v26, 0.0 }
 0x130   : > { %v1122_v30 = vrot.slane %v1120_v27, 6  ;;  %v1125_v32 = vrot.slane %v1123_v28, 7  ;;  %v3498_v33 = vpack.c.bf16 %v1112_v29, %v1112_v29 }
 0x132   : > { %v1126_v35 = vor.u32 %v1125_v32, %v1122_v30  ;;  %v1129_v36 = vshrl.u32 %v3498_v33, 16  ;;  %v1132_v37 = vshll.u32 %v3498_v33, 16 }
 0x134   : > { %v1140_v38 = vsel %vm4120_vm12, %v1126_v35, %v1139_v34  ;;  %v1131_v39 = vrot.slane %v1129_v36, 6  ;;  %v1134_v40 = vrot.slane %v1132_v37, 7  ;;  %v1127_v42 = vrot.slane %v1126_v35, 4 }
 0x135   : > { %1141 = vst [vmem:[#allocation2] sm:$0xe] %v1140_v38 }
 0x136   : > { %v1135_v43 = vor.u32 %v1134_v40, %v1131_v39 }
 0x138   : > { %v1136_v45 = vsel %vm4116_vm11, %v1127_v42, %v1135_v43 }
 0x139   : > { %v1143_v46 = vsel %vm4126_vm13, %v1136_v45, %v1142_v44 }
 0x13a   : > { %1144 = vst [vmem:[#allocation2 + $0x4] sm:$0x7] %v1143_v46 }
 0x13c   : > { %v1145_v47 = vld [vmem:[#allocation2] sm:$0xf] }
 0x13d   : > { %v1149_v48 = vld [vmem:[#allocation2] sm:$0xf]  ;;  %1147 = vst [vmem:[#allocation3] sm:$0xf] %v1145_v47 }
 0x13e   : > { %v1174_v50 = vld [vmem:[#allocation2] sm:$0xe]  ;;  %v1152_v51 = vshrl.u32 %v1149_v48, 16  ;;  %v1155_v54 = vshll.u32 %v1149_v48, 16 }
 0x13f   : > { %v3080_v55 = vrot.slane %v1174_v50, 9  ;;  %v1187_v56 = vld [vmem:[#allocation2] sm:$0xe] }
 0x140   : > { %v1190_v58 = vshrl.u32 %v1187_v56, 16  ;;  %v1193_v59 = vshll.u32 %v1187_v56, 16  ;;  %v1212_v60 = vld [vmem:[#allocation2] sm:$0xc]  ;;  %v1154_v62 = vrot.slane %v1152_v51, 4  ;;  %v1157_v63 = vrot.slane %v1155_v54, 5 }
 0x141   : > { %v1225_v61 = vld [vmem:[#allocation2] sm:$0xc]  ;;  %v3081_v0 = vrot.slane %v1212_v60, 10  ;;  %v1146_v8 = vld [vmem:[#allocation2 + $0x4] sm:$0x1] }
 0x142   : > { %v1228_v1 = vshrl.u32 %v1225_v61, 16  ;;  %v1250_v2 = vld [vmem:[#allocation2] sm:$0x8]  ;;  %v1192_v3 = vrot.slane %v1190_v58, 5  ;;  %v1195_v4 = vrot.slane %v1193_v59, 6  ;;  %v1231_v6 = vshll.u32 %v1225_v61, 16 }
 0x143   : > { %v3082_v7 = vrot.slane %v1250_v2, 11  ;;  %v1150_v9 = vld [vmem:[#allocation2 + $0x4] sm:$0x3]  ;;  %v1158_v10 = vor.u32 %v1157_v63, %v1154_v62  ;;  %1148 = vst [vmem:[#allocation3 + $0x20] sm:$0x1] %v1146_v8 }
 0x144   : > { %v1175_v11 = vld [vmem:[#allocation2 + $0x4] sm:$0x3]  ;;  %v1161_v12 = vshll.u32 %v1150_v9, 16  ;;  %v1165_v13 = vshrl.u32 %v1150_v9, 16  ;;  %v1196_v16 = vor.u32 %v1195_v4, %v1192_v3  ;;  %v1230_v23 = vrot.slane %v1228_v1, 6 }
 0x145   : > { %v1180_v14 = vrot.slane %v1175_v11, 5  ;;  %v1188_v15 = vld [vmem:[#allocation2 + $0x4] sm:$0x7]  ;;  %v1159_v17 = vrot.slane %v1158_v10, 4  ;;  %v1233_v37 = vrot.slane %v1231_v6, 7 }
 0x146   : > { %v1199_v18 = vshrl.u32 %v1188_v15, 16  ;;  %v1202_v19 = vshll.u32 %v1188_v15, 16  ;;  %v1213_v22 = vld [vmem:[#allocation2 + $0x4] sm:$0x7]  ;;  %v1163_v24 = vrot.slane %v1161_v12, 5  ;;  %v1167_v25 = vrot.slane %v1165_v13, 4 }
 0x147   : > { %v1181_v26 = vsel %vm4138_vm3, %v3080_v55, %v1180_v14  ;;  %v1182_v27 = vrot.slane %v1180_v14, 4  ;;  %v1226_v28 = vld [vmem:[#allocation2 + $0x4] sm:$0xf]  ;;  %v1197_v29 = vrot.slane %v1196_v16, 4  ;;  %v1218_v33 = vrot.slane %v1213_v22, 6  ;;  %v3872_v22 = vld [vmem:[%s4746_s1 + $0x3b8] sm:$0xff]  }
 0x148   : > { %1185 = vst [vmem:[#allocation3 + $0x8] sm:$0xf] %v1181_v26  ;;  %v1201_v30 = vrot.slane %v1199_v18, 5  ;;  %v1204_v32 = vrot.slane %v1202_v19, 6  ;;  %v1251_v34 = vld [vmem:[#allocation2 + $0x4] sm:$0xf]  ;;  %v1164_v35 = vsel %vm4146_vm4, %v1159_v17, %v1163_v24  ;;  %v1168_v36 = vor.u32 %v1167_v25, %v1163_v24 }
 0x149   : > { %1186 = vst [vmem:[#allocation3 + $0x28] sm:$0x1] %v1182_v27  ;;  %v1237_v38 = vshrl.u32 %v1226_v28, 16  ;;  %1172 = vst [vmem:[#allocation3 + $0x4] sm:$0xf] %v1164_v35  ;;  %v1219_v40 = vsel %vm4188_vm10, %v3081_v0, %v1218_v33  ;;  %v1220_v42 = vrot.slane %v1218_v33, 4  ;;  %v1234_v47 = vor.u32 %v1233_v37, %v1230_v23 }
 0x14a   : > { %v1205_v39 = vor.u32 %v1204_v32, %v1201_v30  ;;  %v1240_v43 = vshll.u32 %v1226_v28, 16  ;;  %v1263_v44 = vld [vmem:[#allocation2] sm:$0x8]  ;;  %v1264_v45 = vld [vmem:[#allocation2 + $0x4] sm:$0xf]  ;;  %v1169_v46 = vrot.slane %v1168_v36, 4 }
 0x14b   : > { %1223 = vst [vmem:[#allocation3 + $0x10] sm:$0xf] %v1219_v40  ;;  %v1239_v48 = vrot.slane %v1237_v38, 6  ;;  %v1256_v50 = vrot.slane %v1251_v34, 7  ;;  %1224 = vst [vmem:[#allocation3 + $0x30] sm:$0x1] %v1220_v42 }
 0x14c   : > { %v1206_v51 = vsel %vm4154_vm5, %v1197_v29, %v1205_v39  ;;  %v1207_v54 = vrot.slane %v1205_v39, 4  ;;  %v1242_v55 = vrot.slane %v1240_v43, 7  ;;  %v1265_v56 = vld [vmem:[#allocation2 + $0x8] sm:$0x1]  ;;  %1173 = vst [vmem:[#allocation3 + $0x24] sm:$0x1] %v1169_v46 }
 0x14d   : > { %1210 = vst [vmem:[#allocation3 + $0xc] sm:$0xf] %v1206_v51  ;;  %v1257_v58 = vsel %vm4219_vm15, %v3082_v7, %v1256_v50  ;;  %v1258_v59 = vrot.slane %v1256_v50, 4  ;;  %v1267_v60 = vshrl.u32 %v1263_v44, 16  ;;  %v1272_v61 = vshrl.u32 %v1264_v45, 16  ;;  %v3871_v17 = vld [vmem:[%s4746_s1 + $0x338] sm:$0xff]  }
 0x14e   : > { %1211 = vst [vmem:[#allocation3 + $0x2c] sm:$0x1] %v1207_v54  ;;  %v1235_v62 = vrot.slane %v1234_v47, 4  ;;  %v1243_v63 = vor.u32 %v1242_v55, %v1239_v48  ;;  %1261 = vst [vmem:[#allocation3 + $0x18] sm:$0xf] %v1257_v58  ;;  %v1275_v1 = vshll.u32 %v1264_v45, 16 }
 0x14f   : > { %1262 = vst [vmem:[#allocation3 + $0x38] sm:$0x1] %v1258_v59  ;;  %v1274_v0 = vrot.slane %v1272_v61, 7  ;;  %v1281_v2 = vshll.u32 %v1265_v56, 16  ;;  %v3083_v6 = vrot.slane %v1267_v60, 11  ;;  %v3873_v23 = vld [vmem:[%s4746_s1 + $0x370] sm:$0xff]  }
 0x150   : > { %v1244_v3 = vsel %vm4116_vm11, %v1235_v62, %v1243_v63  ;;  %v1245_v4 = vrot.slane %v1243_v63, 4  ;;  %v1288_v11 = vld [vmem:[#allocation3] sm:$0xff]  ;;  %v3881_v38 = vld [vmem:[%s4746_s1 + $0x360] sm:$0xff]   ;;  %v3885_v43 = vld [vmem:[%s4746_s1 + $0x358] sm:$0xff]  }
 0x151   : > { %1248 = vst [vmem:[#allocation3 + $0x14] sm:$0xf] %v1244_v3  ;;  %v1277_v8 = vor.u32 %v1275_v1, %v1274_v0  ;;  %v1279_v9 = vrot.slane %v1274_v0, 4  ;;  %v3874_v24 = vld [vmem:[%s4746_s1 + $0x3f0] sm:$0xff]   ;;  %v3877_v30 = vld [vmem:[%s4746_s1 + $0x368] sm:$0xff]   ;;  %v3882_v39 = vld [vmem:[%s4746_s1 + $0x3e0] sm:$0xff]  }
 0x152   : > { %1249 = vst [vmem:[#allocation3 + $0x34] sm:$0x1] %v1245_v4  ;;  %v3875_v27 = vld [vmem:[%s4746_s1 + $0x330] sm:$0xff]   ;;  %v3878_v34 = vld [vmem:[%s4746_s1 + $0x3e8] sm:$0xff]   ;;  %v3883_v40 = vld [vmem:[%s4746_s1 + $0x320] sm:$0xff]  }
 0x153   : > { %v1278_v7 = vsel %vm4239_vm1, %v3083_v6, %v1277_v8  ;;  %v1283_v10 = vsel %vm4239_vm1, %v1279_v9, %v1281_v2  ;;  %v1292_v12 = vld [vmem:[#allocation3 + $0x20] sm:$0x11]  ;;  %v3884_v42 = vld [vmem:[%s4746_s1 + $0x3a0] sm:$0xff]   ;;  %v3886_v44 = vld [vmem:[%s4746_s1 + $0x3d8] sm:$0xff]  }
 0x154   : > { %v1289_v13 = vld [vmem:[#allocation3 + $0x8] sm:$0xff]  ;;  %1286 = vst [vmem:[#allocation3 + $0x1c] sm:$0xf] %v1278_v7  ;;  %1287 = vst [vmem:[#allocation3 + $0x3c] sm:$0x1] %v1283_v10  ;;  %v3215_v14 = vcombine.high %v1288_v11, %v1292_v12  ;;  %v3214_v16 = vcombine.low %v1288_v11, %v1292_v12  ;;  %v3879_v36 = vld [vmem:[%s4746_s1 + $0x328] sm:$0xff]  }
 0x155   : > { %v1293_v15 = vld [vmem:[#allocation3 + $0x28] sm:$0x11]  ;;  %v3880_v37 = vld [vmem:[%s4746_s1 + $0x3a8] sm:$0xff]   ;;  %v3897_v59 = vld [vmem:[%s4746_s1 + $0x340] sm:$0xff]  }
 0x156   : > { %v3217_v18 = vcombine.high %v1289_v13, %v1293_v15  ;;  %v3216_v19 = vcombine.low %v1289_v13, %v1293_v15  ;;  %1889 = vmatprep.mubr.bf16.mxu0 %v3215_v14  ;;  %v3876_v29 = vld [vmem:[%s4746_s1 + $0x3b0] sm:$0xff]   ;;  %v3887_v45 = vld [vmem:[%s4746_s1 + $0x318] sm:$0xff]   ;;  %v3893_v54 = vld [vmem:[%s4746_s1 + $0x348] sm:$0xff]  }
 0x157   : > { %1890 = vmatmul.mubr.bf16.vlgmr.msra.gmra.mxu0 %v3214_v16  ;;  %v3888_v46 = vld [vmem:[%s4746_s1 + $0x398] sm:$0xff]   ;;  %v3889_v47 = vld [vmem:[%s4746_s1 + $0x350] sm:$0xff]   ;;  %v3894_v55 = vld [vmem:[%s4746_s1 + $0x3c8] sm:$0xff]  }
 0x158   : > { %1930 = vmatprep.mubr.bf16.mxu1 %v3217_v18  ;;  %v4424_v25 = vld [vmem:[#allocation3 + $0x10] sm:$0xff]  ;;  %3634 = vmatpush3.bf16.msra.mxu0 %v3871_v17  ;;  %v3890_v48 = vld [vmem:[%s4746_s1 + $0x3d0] sm:$0xff]   ;;  %v3895_v56 = vld [vmem:[%s4746_s1 + $0x308] sm:$0xff]  }
 0x159   : > { %1931 = vmatmul.mubr.bf16.vlgmr.msra.gmra.mxu1 %v3216_v19  ;;  %v4426_v26 = vld [vmem:[#allocation3 + $0x30] sm:$0x11]  ;;  %3635 = vmatprep.subr.bf16.mxu0 %v3873_v23  ;;  %v3891_v50 = vld [vmem:[%s4746_s1 + $0x310] sm:$0xff]   ;;  %v3896_v58 = vld [vmem:[%s4746_s1 + $0x388] sm:$0xff]  }
 0x15a   : > { %3656 = vmatpush3.bf16.msra.mxu1 %v3872_v22  ;;  %v3219_v28 = vcombine.high %v4424_v25, %v4426_v26  ;;  %v3892_v51 = vld [vmem:[%s4746_s1 + $0x390] sm:$0xff]   ;;  %v3898_v60 = vld [vmem:[%s4746_s1 + $0x3c0] sm:$0xff]   ;;  %v3218_v63 = vcombine.low %v4424_v25, %v4426_v26  ;;  %v3901_v1 = vld [vmem:[%s4746_s1 + $0x478] sm:$0xff]  }
 0x15b   : > { %v1291_v32 = vld [vmem:[#allocation3 + $0x18] sm:$0xff]  ;;  %3657 = vmatprep.subr.bf16.mxu1 %v3874_v24  ;;  %v3902_v2 = vld [vmem:[%s4746_s1 + $0x4f8] sm:$0xff]   ;;  %v3905_v6 = vld [vmem:[%s4746_s1 + $0x470] sm:$0xff]  }
 0x15c   : > { %v1295_v33 = vld [vmem:[#allocation3 + $0x38] sm:$0x11]  ;;  %1971 = vmatprep.mubr.bf16.mxu0 %v3219_v28  ;;  %3636 = vmatpush3.bf16.msra.mxu0 %v3875_v27  ;;  %v3903_v3 = vld [vmem:[%s4746_s1 + $0x438] sm:$0xff]   ;;  %v3906_v8 = vld [vmem:[%s4746_s1 + $0x4f0] sm:$0xff]  }
 0x15d   : > { %v3221_v35 = vcombine.high %v1291_v32, %v1295_v33  ;;  %3637 = vmatprep.subr.bf16.mxu0 %v3877_v30  ;;  %v3899_v61 = vld [vmem:[%s4746_s1 + $0x300] sm:$0xff]   ;;  %v3220_v0 = vcombine.low %v1291_v32, %v1295_v33  ;;  %v3904_v4 = vld [vmem:[%s4746_s1 + $0x4b8] sm:$0xff]   ;;  %v3907_v9 = vld [vmem:[%s4746_s1 + $0x430] sm:$0xff]  }
 0x15e   : > { %3658 = vmatpush3.bf16.msra.mxu1 %v3876_v29  ;;  %v3900_v62 = vld [vmem:[%s4746_s1 + $0x380] sm:$0xff]   ;;  %v3908_v7 = vld [vmem:[%s4746_s1 + $0x4b0] sm:$0xff]   ;;  %v3909_v10 = vld [vmem:[%s4746_s1 + $0x468] sm:$0xff]  }
 0x15f   : > { %2012 = vmatprep.mubr.bf16.mxu1 %v3221_v35  ;;  %3659 = vmatprep.subr.bf16.mxu1 %v3878_v34  ;;  %v3910_v11 = vld [vmem:[%s4746_s1 + $0x4e8] sm:$0xff]   ;;  %v3913_v14 = vld [vmem:[%s4746_s1 + $0x460] sm:$0xff]   ;;  %v3917_v18 = vld [vmem:[%s4746_s1 + $0x458] sm:$0xff]  }
 0x160   : > { %3638 = vmatpush3.bf16.msra.mxu0 %v3879_v36  ;;  %v3911_v12 = vld [vmem:[%s4746_s1 + $0x428] sm:$0xff]   ;;  %v3914_v15 = vld [vmem:[%s4746_s1 + $0x4e0] sm:$0xff]   ;;  %v3918_v19 = vld [vmem:[%s4746_s1 + $0x4d8] sm:$0xff]  }
 0x161   : > { %3639 = vmatprep.subr.bf16.mxu0 %v3881_v38  ;;  %v3912_v13 = vld [vmem:[%s4746_s1 + $0x4a8] sm:$0xff]   ;;  %v3915_v16 = vld [vmem:[%s4746_s1 + $0x420] sm:$0xff]   ;;  %v3919_v22 = vld [vmem:[%s4746_s1 + $0x418] sm:$0xff]  }
 0x162   : > { %3660 = vmatpush3.bf16.msra.mxu1 %v3880_v37  ;;  %v3916_v17 = vld [vmem:[%s4746_s1 + $0x4a0] sm:$0xff]   ;;  %v3920_v23 = vld [vmem:[%s4746_s1 + $0x498] sm:$0xff]   ;;  %v3921_v24 = vld [vmem:[%s4746_s1 + $0x450] sm:$0xff]  }
 0x163   : > { %3661 = vmatprep.subr.bf16.mxu1 %v3882_v39  ;;  %v3922_v25 = vld [vmem:[%s4746_s1 + $0x4d0] sm:$0xff]   ;;  %v3925_v28 = vld [vmem:[%s4746_s1 + $0x448] sm:$0xff]   ;;  %v3929_v33 = vld [vmem:[%s4746_s1 + $0x440] sm:$0xff]  }
 0x164   : > { %3640 = vmatpush3.bf16.msra.mxu0 %v3883_v40  ;;  %v3923_v26 = vld [vmem:[%s4746_s1 + $0x410] sm:$0xff]   ;;  %v3926_v29 = vld [vmem:[%s4746_s1 + $0x4c8] sm:$0xff]   ;;  %v3930_v34 = vld [vmem:[%s4746_s1 + $0x4c0] sm:$0xff]  }
 0x165   : > { %3641 = vmatprep.subr.bf16.mxu0 %v3885_v43  ;;  %v3924_v27 = vld [vmem:[%s4746_s1 + $0x490] sm:$0xff]   ;;  %v3927_v30 = vld [vmem:[%s4746_s1 + $0x408] sm:$0xff]   ;;  %v3931_v35 = vld [vmem:[%s4746_s1 + $0x400] sm:$0xff]  }
 0x166   : > { %3662 = vmatpush3.bf16.msra.mxu1 %v3884_v42  ;;  %v3928_v32 = vld [vmem:[%s4746_s1 + $0x488] sm:$0xff]   ;;  %v3932_v36 = vld [vmem:[%s4746_s1 + $0x480] sm:$0xff]   ;;  %v3933_v37 = vld [vmem:[%s4746_s1 + $0x578] sm:$0xff]  }
 0x167   : > { %3663 = vmatprep.subr.bf16.mxu1 %v3886_v44  ;;  %v3934_v38 = vld [vmem:[%s4746_s1 + $0x5f8] sm:$0xff]  }
 0x168   : > { %3642 = vmatpush3.bf16.msra.mxu0 %v3887_v45 }
 0x169   : > { %3643 = vmatprep.subr.bf16.mxu0 %v3889_v47  ;;  %v3213_v47 = vld [vmem:[%s4747_s2 + $0x1] ss:$0 sm:$0xff] }
 0x16a   : > { %3664 = vmatpush3.bf16.msra.mxu1 %v3888_v46 }
 0x16b   : > { %3665 = vmatprep.subr.bf16.mxu1 %v3890_v48 }
 0x16c   : > { %3644 = vmatpush3.bf16.msra.mxu0 %v3891_v50 }
 0x16d   : > { %3645 = vmatprep.subr.bf16.mxu0 %v3893_v54 }
 0x16e   : > { %3666 = vmatpush3.bf16.msra.mxu1 %v3892_v51 }
 0x16f   : > { %3667 = vmatprep.subr.bf16.mxu1 %v3894_v55 }
 0x170   : > { %3646 = vmatpush3.bf16.msra.mxu0 %v3895_v56 }
 0x171   : > { %3647 = vmatprep.subr.bf16.mxu0 %v3897_v59 }
 0x172   : > { %3668 = vmatpush3.bf16.msra.mxu1 %v3896_v58 }
 0x173   : > { %3669 = vmatprep.subr.bf16.mxu1 %v3898_v60 }
 0x174   : > { %3648 = vmatpush3.bf16.msra.mxu0 %v3899_v61 }
 0x175   : > { %3677 = vmatprep.subr.bf16.mxu0 %v3901_v1 }
 0x176   : > { %3670 = vmatpush3.bf16.msra.mxu1 %v3900_v62 }
 0x177   : > { %1972 = vmatmul.mubr.bf16.vlgmr.msra.gmra.mxu0 %v3218_v63  ;;  %3699 = vmatprep.subr.bf16.mxu1 %v3902_v2 }
 0x178   : > { %3678 = vmatpush3.bf16.msra.mxu0 %v3903_v3 }
 0x179   : > { %2013 = vmatmul.mubr.bf16.vlgmr.msra.gmra.mxu1 %v3220_v0  ;;  %3679 = vmatprep.subr.bf16.mxu0 %v3905_v6 }
 0x17a   : > { %3700 = vmatpush3.bf16.msra.mxu1 %v3904_v4 }
 0x17b   : > { %3701 = vmatprep.subr.bf16.mxu1 %v3906_v8 }
 0x17c   : > { %3680 = vmatpush3.bf16.msra.mxu0 %v3907_v9 }
 0x17d   : > { %3681 = vmatprep.subr.bf16.mxu0 %v3909_v10 }
 0x17e   : > { %3702 = vmatpush3.bf16.msra.mxu1 %v3908_v7 }
 0x17f   : > { %3703 = vmatprep.subr.bf16.mxu1 %v3910_v11 }
 0x180   : > { %3682 = vmatpush3.bf16.msra.mxu0 %v3911_v12 }
 0x181   : > { %3683 = vmatprep.subr.bf16.mxu0 %v3913_v14 }
 0x182   : > { %3704 = vmatpush3.bf16.msra.mxu1 %v3912_v13 }
 0x183   : > { %3705 = vmatprep.subr.bf16.mxu1 %v3914_v15 }
 0x184   : > { %3684 = vmatpush3.bf16.msra.mxu0 %v3915_v16 }
 0x185   : > { %3685 = vmatprep.subr.bf16.mxu0 %v3917_v18 }
 0x186   : > { %3706 = vmatpush3.bf16.msra.mxu1 %v3916_v17 }
 0x187   : > { %3707 = vmatprep.subr.bf16.mxu1 %v3918_v19 }
 0x188   : > { %3686 = vmatpush3.bf16.msra.mxu0 %v3919_v22 }
 0x189   : > { %3687 = vmatprep.subr.bf16.mxu0 %v3921_v24 }
 0x18a   : > { %3708 = vmatpush3.bf16.msra.mxu1 %v3920_v23 }
 0x18b   : > { %3709 = vmatprep.subr.bf16.mxu1 %v3922_v25 }
 0x18c   : > { %3688 = vmatpush3.bf16.msra.mxu0 %v3923_v26 }
 0x18d   : > { %3689 = vmatprep.subr.bf16.mxu0 %v3925_v28 }
 0x18e   : > { %3710 = vmatpush3.bf16.msra.mxu1 %v3924_v27  ;;  %v2049_v27 = vld [vmem:[#allocation2] sm:$0xe] }
 0x18f   : > { %3711 = vmatprep.subr.bf16.mxu1 %v3926_v29 }
 0x190   : > { %3690 = vmatpush3.bf16.msra.mxu0 %v3927_v30 }
 0x191   : > { %3691 = vmatprep.subr.bf16.mxu0 %v3929_v33 }
 0x192   : > { %3712 = vmatpush3.bf16.msra.mxu1 %v3928_v32 }
 0x193   : > { %3713 = vmatprep.subr.bf16.mxu1 %v3930_v34 }
 0x194   : > { %3692 = vmatpush3.bf16.msra.mxu0 %v3931_v35  ;;  %v2052_v35 = vld [vmem:[#allocation2 + $0x4] sm:$0x7] }
 0x195   : > { %3721 = vmatprep.subr.bf16.mxu0 %v3933_v37 }
 0x196   : > { %3714 = vmatpush3.bf16.msra.mxu1 %v3932_v36 }
 0x197   : > { %3743 = vmatprep.subr.bf16.mxu1 %v3934_v38 }
 0x217   : > { %v3605_v39 = vpop.f32.mrf.mxu0 }
 0x219   : > { %v3627_v40 = vpop.f32.mrf.mxu1  ;;  %v3606_v42 = vpop.f32.mrf.mxu0 }
 0x21a   : > { %v3607_v45 = vadd.f32 %v3606_v42, %v3605_v39 }
 0x21b   : > { %v3628_v43 = vpop.f32.mrf.mxu1  ;;  %v3608_v44 = vpop.f32.mrf.mxu0 }
 0x21c   : > { %v1892_v50 = vadd.f32 %v3607_v45, %v3213_v47  ;;  %v3629_v56 = vadd.f32 %v3628_v43, %v3627_v40 }
 0x21d   : > { %v3630_v46 = vpop.f32.mrf.mxu1  ;;  %v3609_v48 = vpop.f32.mrf.mxu0 }
 0x21e   : > { %v3610_v51 = vadd.f32 %v3609_v48, %v3608_v44  ;;  %v1933_v60 = vadd.f32 %v3629_v56, %v1892_v50 }
 0x21f   : > { %v3631_v54 = vpop.f32.mrf.mxu1 }
 0x220   : > { %v1895_v61 = vadd.f32 %v3610_v51, %v3213_v47  ;;  %v3632_v1 = vadd.f32 %v3631_v54, %v3630_v46 }
 0x222   : > { %v1936_v8 = vadd.f32 %v3632_v1, %v1895_v61 }
 0x237   : > { %v3649_v55 = vpop.f32.mrf.mxu0 }
 0x239   : > { %v3671_v58 = vpop.f32.mrf.mxu1  ;;  %v3650_v59 = vpop.f32.mrf.mxu0 }
 0x23a   : > { %v3651_v62 = vadd.f32 %v3650_v59, %v3649_v55 }
 0x23b   : > { %v3672_v63 = vpop.f32.mrf.mxu1  ;;  %v3652_v0 = vpop.f32.mrf.mxu0 }
 0x23c   : > { %v1974_v2 = vadd.f32 %v3651_v62, %v1933_v60  ;;  %v3673_v3 = vadd.f32 %v3672_v63, %v3671_v58 }
 0x23d   : > { %v3674_v4 = vpop.f32.mrf.mxu1  ;;  %v3653_v6 = vpop.f32.mrf.mxu0 }
 0x23e   : > { %v2015_v9 = vadd.f32 %v3673_v3, %v1974_v2  ;;  %v3654_v7 = vadd.f32 %v3653_v6, %v3652_v0 }
 0x23f   : > { %v3675_v10 = vpop.f32.mrf.mxu1 }
 0x240   : > { %v2021_v11 = vmax.f32 %v2015_v9, 0.0  ;;  %v1977_v12 = vadd.f32 %v3654_v7, %v1936_v8  ;;  %v3676_v13 = vadd.f32 %v3675_v10, %v3674_v4 }
 0x242   : > { %v3499_v14 = vpack.c.bf16 %v2021_v11, %v2021_v11  ;;  %v2018_v15 = vadd.f32 %v3676_v13, %v1977_v12 }
 0x244   : > { %v2030_v16 = vshrl.u32 %v3499_v14, 16  ;;  %v2033_v17 = vshll.u32 %v3499_v14, 16  ;;  %v2022_v18 = vmax.f32 %v2018_v15, 0.0 }
 0x246   : > { %v2032_v19 = vrot.slane %v2030_v16, 6  ;;  %v2035_v22 = vrot.slane %v2033_v17, 7  ;;  %v3500_v23 = vpack.c.bf16 %v2022_v18, %v2022_v18 }
 0x248   : > { %v2036_v24 = vor.u32 %v2035_v22, %v2032_v19  ;;  %v2039_v25 = vshrl.u32 %v3500_v23, 16  ;;  %v2042_v26 = vshll.u32 %v3500_v23, 16 }
 0x24a   : > { %v2050_v28 = vsel %vm4120_vm12, %v2036_v24, %v2049_v27  ;;  %v2041_v29 = vrot.slane %v2039_v25, 6  ;;  %v2044_v30 = vrot.slane %v2042_v26, 7  ;;  %v2037_v32 = vrot.slane %v2036_v24, 4 }
 0x24b   : > { %2051 = vst [vmem:[#allocation2] sm:$0xe] %v2050_v28 }
 0x24c   : > { %v2045_v33 = vor.u32 %v2044_v30, %v2041_v29 }
 0x24e   : > { %v2046_v34 = vsel %vm4116_vm11, %v2037_v32, %v2045_v33 }
 0x24f   : > { %v2053_v36 = vsel %vm4126_vm13, %v2046_v34, %v2052_v35 }
 0x250   : > { %2054 = vst [vmem:[#allocation2 + $0x4] sm:$0x7] %v2053_v36 }
 0x252   : > { %v2055_v37 = vld [vmem:[#allocation2] sm:$0xf] }
 0x253   : > { %v2059_v38 = vld [vmem:[#allocation2] sm:$0xf]  ;;  %2057 = vst [vmem:[#allocation3] sm:$0xf] %v2055_v37 }
 0x254   : > { %v2084_v39 = vld [vmem:[#allocation2] sm:$0xe]  ;;  %v2062_v40 = vshrl.u32 %v2059_v38, 16  ;;  %v2065_v52 = vshll.u32 %v2059_v38, 16 }
 0x255   : > { %v3288_v42 = vrot.slane %v2084_v39, 9  ;;  %v2097_v43 = vld [vmem:[#allocation2] sm:$0xe]  ;;  %v2175_v39 = vld [vmem:[#allocation2 + $0x8] sm:$0x1] }
 0x256   : > { %v2100_v44 = vshrl.u32 %v2097_v43, 16  ;;  %v2103_v45 = vshll.u32 %v2097_v43, 16  ;;  %v2122_v46 = vld [vmem:[#allocation2] sm:$0xc]  ;;  %v2064_v48 = vrot.slane %v2062_v40, 4  ;;  %v2067_v50 = vrot.slane %v2065_v52, 5 }
 0x257   : > { %v2135_v47 = vld [vmem:[#allocation2] sm:$0xc]  ;;  %v3289_v51 = vrot.slane %v2122_v46, 10  ;;  %v2056_v60 = vld [vmem:[#allocation2 + $0x4] sm:$0x1]  ;;  %v2191_v46 = vshll.u32 %v2175_v39, 16 }
 0x258   : > { %v2138_v54 = vshrl.u32 %v2135_v47, 16  ;;  %v2160_v55 = vld [vmem:[#allocation2] sm:$0x8]  ;;  %v2102_v53 = vrot.slane %v2100_v44, 5  ;;  %v2105_v56 = vrot.slane %v2103_v45, 6  ;;  %v2141_v58 = vshll.u32 %v2135_v47, 16 }
 0x259   : > { %v3290_v59 = vrot.slane %v2160_v55, 11  ;;  %v2060_v61 = vld [vmem:[#allocation2 + $0x4] sm:$0x3]  ;;  %v2068_v62 = vor.u32 %v2067_v50, %v2064_v48  ;;  %2058 = vst [vmem:[#allocation3 + $0x20] sm:$0x1] %v2056_v60 }
 0x25a   : > { %v2085_v63 = vld [vmem:[#allocation2 + $0x4] sm:$0x3]  ;;  %v2071_v0 = vshll.u32 %v2060_v61, 16  ;;  %v2075_v1 = vshrl.u32 %v2060_v61, 16  ;;  %v2106_v4 = vor.u32 %v2105_v56, %v2102_v53  ;;  %v2140_v10 = vrot.slane %v2138_v54, 6  ;;  %v3935_v61 = vld [vmem:[%s4746_s1 + $0x538] sm:$0xff]  }
 0x25b   : > { %v2090_v2 = vrot.slane %v2085_v63, 5  ;;  %v2098_v3 = vld [vmem:[#allocation2 + $0x4] sm:$0x7]  ;;  %v2069_v6 = vrot.slane %v2068_v62, 4  ;;  %v2143_v25 = vrot.slane %v2141_v58, 7 }
 0x25c   : > { %v2109_v8 = vshrl.u32 %v2098_v3, 16  ;;  %v2112_v9 = vshll.u32 %v2098_v3, 16  ;;  %v2123_v7 = vld [vmem:[#allocation2 + $0x4] sm:$0x7]  ;;  %v2073_v11 = vrot.slane %v2071_v0, 5  ;;  %v2077_v12 = vrot.slane %v2075_v1, 4 }
 0x25d   : > { %v2091_v13 = vsel %vm4138_vm3, %v3288_v42, %v2090_v2  ;;  %v2092_v14 = vrot.slane %v2090_v2, 4  ;;  %v2136_v15 = vld [vmem:[#allocation2 + $0x4] sm:$0xf]  ;;  %v2107_v16 = vrot.slane %v2106_v4, 4  ;;  %v2128_v19 = vrot.slane %v2123_v7, 6  ;;  %v3936_v0 = vld [vmem:[%s4746_s1 + $0x5b8] sm:$0xff]  }
 0x25e   : > { %2095 = vst [vmem:[#allocation3 + $0x8] sm:$0xf] %v2091_v13  ;;  %v2111_v17 = vrot.slane %v2109_v8, 5  ;;  %v2114_v18 = vrot.slane %v2112_v9, 6  ;;  %v2161_v22 = vld [vmem:[#allocation2 + $0x4] sm:$0xf]  ;;  %v2074_v23 = vsel %vm4146_vm4, %v2069_v6, %v2073_v11  ;;  %v2078_v24 = vor.u32 %v2077_v12, %v2073_v11 }
 0x25f   : > { %2096 = vst [vmem:[#allocation3 + $0x28] sm:$0x1] %v2092_v14  ;;  %v2147_v26 = vshrl.u32 %v2136_v15, 16  ;;  %2082 = vst [vmem:[#allocation3 + $0x4] sm:$0xf] %v2074_v23  ;;  %v2129_v5 = vsel %vm4188_vm10, %v3289_v51, %v2128_v19  ;;  %v2130_v28 = vrot.slane %v2128_v19, 4  ;;  %v2144_v34 = vor.u32 %v2143_v25, %v2140_v10 }
 0x260   : > { %v2115_v27 = vor.u32 %v2114_v18, %v2111_v17  ;;  %v2150_v29 = vshll.u32 %v2136_v15, 16  ;;  %v2173_v30 = vld [vmem:[#allocation2] sm:$0x8]  ;;  %v2174_v32 = vld [vmem:[#allocation2 + $0x4] sm:$0xf]  ;;  %v2079_v33 = vrot.slane %v2078_v24, 4 }
 0x261   : > { %2133 = vst [vmem:[#allocation3 + $0x10] sm:$0xf] %v2129_v5  ;;  %v2149_v35 = vrot.slane %v2147_v26, 6  ;;  %v2166_v36 = vrot.slane %v2161_v22, 7  ;;  %2134 = vst [vmem:[#allocation3 + $0x30] sm:$0x1] %v2130_v28 }
 0x262   : > { %v2116_v20 = vsel %vm4154_vm5, %v2107_v16, %v2115_v27  ;;  %v2117_v37 = vrot.slane %v2115_v27, 4  ;;  %v2152_v38 = vrot.slane %v2150_v29, 7  ;;  %2083 = vst [vmem:[#allocation3 + $0x24] sm:$0x1] %v2079_v33  ;;  %v2177_v52 = vshrl.u32 %v2173_v30, 16  ;;  %v3938_v1 = vld [vmem:[%s4746_s1 + $0x5f0] sm:$0xff]  }
 0x263   : > { %2120 = vst [vmem:[#allocation3 + $0xc] sm:$0xf] %v2116_v20  ;;  %v2167_v57 = vsel %vm4219_vm15, %v3290_v59, %v2166_v36  ;;  %v2168_v40 = vrot.slane %v2166_v36, 4  ;;  %v2182_v42 = vshrl.u32 %v2174_v32, 16  ;;  %v2145_v43 = vrot.slane %v2144_v34, 4  ;;  %v3939_v4 = vld [vmem:[%s4746_s1 + $0x530] sm:$0xff]  }
 0x264   : > { %2121 = vst [vmem:[#allocation3 + $0x2c] sm:$0x1] %v2117_v37  ;;  %v2153_v44 = vor.u32 %v2152_v38, %v2149_v35  ;;  %2171 = vst [vmem:[#allocation3 + $0x18] sm:$0xf] %v2167_v57  ;;  %v2185_v31 = vshll.u32 %v2174_v32, 16  ;;  %v3291_v50 = vrot.slane %v2177_v52, 11 }
 0x265   : > { %2172 = vst [vmem:[#allocation3 + $0x38] sm:$0x1] %v2168_v40  ;;  %v2184_v45 = vrot.slane %v2182_v42, 7  ;;  %v3940_v8 = vld [vmem:[%s4746_s1 + $0x5b0] sm:$0xff]   ;;  %v3941_v9 = vld [vmem:[%s4746_s1 + $0x568] sm:$0xff]   ;;  %v3945_v15 = vld [vmem:[%s4746_s1 + $0x560] sm:$0xff]  }
 0x266   : > { %v2154_v47 = vsel %vm4116_vm11, %v2145_v43, %v2153_v44  ;;  %v2155_v48 = vrot.slane %v2153_v44, 4  ;;  %v2198_v53 = vld [vmem:[#allocation3] sm:$0xff]  ;;  %v3946_v16 = vld [vmem:[%s4746_s1 + $0x5e0] sm:$0xff]   ;;  %v3949_v19 = vld [vmem:[%s4746_s1 + $0x558] sm:$0xff]  }
 0x267   : > { %2158 = vst [vmem:[#allocation3 + $0x14] sm:$0xf] %v2154_v47  ;;  %v2187_v51 = vor.u32 %v2185_v31, %v2184_v45  ;;  %v2189_v21 = vrot.slane %v2184_v45, 4  ;;  %v3942_v11 = vld [vmem:[%s4746_s1 + $0x5e8] sm:$0xff]   ;;  %v3947_v17 = vld [vmem:[%s4746_s1 + $0x520] sm:$0xff]   ;;  %v3950_v22 = vld [vmem:[%s4746_s1 + $0x5d8] sm:$0xff]  }
 0x268   : > { %2159 = vst [vmem:[#allocation3 + $0x34] sm:$0x1] %v2155_v48  ;;  %v3943_v13 = vld [vmem:[%s4746_s1 + $0x528] sm:$0xff]   ;;  %v3948_v18 = vld [vmem:[%s4746_s1 + $0x5a0] sm:$0xff]   ;;  %v3951_v23 = vld [vmem:[%s4746_s1 + $0x518] sm:$0xff]  }
 0x269   : > { %v2188_v54 = vsel %vm4239_vm1, %v3291_v50, %v2187_v51  ;;  %v2193_v55 = vsel %vm4239_vm1, %v2189_v21, %v2191_v46  ;;  %v2202_v56 = vld [vmem:[#allocation3 + $0x20] sm:$0x11]  ;;  %v3952_v24 = vld [vmem:[%s4746_s1 + $0x598] sm:$0xff]   ;;  %v3961_v33 = vld [vmem:[%s4746_s1 + $0x540] sm:$0xff]  }
 0x26a   : > { %v2199_v58 = vld [vmem:[#allocation3 + $0x8] sm:$0xff]  ;;  %2196 = vst [vmem:[#allocation3 + $0x1c] sm:$0xf] %v2188_v54  ;;  %2197 = vst [vmem:[#allocation3 + $0x3c] sm:$0x1] %v2193_v55  ;;  %v3422_v59 = vcombine.low %v2198_v53, %v2202_v56  ;;  %v3423_v49 = vcombine.high %v2198_v53, %v2202_v56  ;;  %v3944_v14 = vld [vmem:[%s4746_s1 + $0x5a8] sm:$0xff]  }
 0x26b   : > { %v2203_v60 = vld [vmem:[#allocation3 + $0x28] sm:$0x11]  ;;  %v3957_v28 = vld [vmem:[%s4746_s1 + $0x548] sm:$0xff]   ;;  %v3962_v34 = vld [vmem:[%s4746_s1 + $0x5c0] sm:$0xff]  }
 0x26c   : > { %v3424_v62 = vcombine.low %v2199_v58, %v2203_v60  ;;  %v3425_v63 = vcombine.high %v2199_v58, %v2203_v60  ;;  %2799 = vmatprep.mubr.bf16.mxu0 %v3423_v49  ;;  %v3953_v25 = vld [vmem:[%s4746_s1 + $0x550] sm:$0xff]   ;;  %v3958_v29 = vld [vmem:[%s4746_s1 + $0x5c8] sm:$0xff]   ;;  %v3963_v35 = vld [vmem:[%s4746_s1 + $0x500] sm:$0xff]  }
 0x26d   : > { %2800 = vmatmul.mubr.bf16.vlgmr.msra.gmra.mxu0 %v3422_v59  ;;  %v3954_v26 = vld [vmem:[%s4746_s1 + $0x5d0] sm:$0xff]   ;;  %v3959_v30 = vld [vmem:[%s4746_s1 + $0x508] sm:$0xff]   ;;  %v3964_v36 = vld [vmem:[%s4746_s1 + $0x580] sm:$0xff]  }
 0x26e   : > { %2839 = vmatprep.mubr.bf16.mxu1 %v3425_v63  ;;  %v4649_v2 = vld [vmem:[#allocation3 + $0x10] sm:$0xff]  ;;  %3722 = vmatpush3.bf16.msra.mxu0 %v3935_v61  ;;  %v3955_v27 = vld [vmem:[%s4746_s1 + $0x510] sm:$0xff]   ;;  %v3960_v32 = vld [vmem:[%s4746_s1 + $0x588] sm:$0xff]  }
 0x26f   : > { %2840 = vmatmul.mubr.bf16.vlgmr.msra.gmra.mxu1 %v3424_v62  ;;  %v4651_v3 = vld [vmem:[#allocation3 + $0x30] sm:$0x11]  ;;  %3723 = vmatprep.subr.bf16.mxu0 %v3937_v41  ;;  %v3956_v5 = vld [vmem:[%s4746_s1 + $0x590] sm:$0xff]   ;;  %v3421_v31 = vld [vmem:[%s4747_s2 + $0x2] ss:$0 sm:$0xff] }
 0x270   : > { %3744 = vmatpush3.bf16.msra.mxu1 %v3936_v0  ;;  %v3427_v6 = vcombine.high %v4649_v2, %v4651_v3  ;;  %v3426_v20 = vcombine.low %v4649_v2, %v4651_v3 }
 0x271   : > { %v2201_v7 = vld [vmem:[#allocation3 + $0x18] sm:$0xff]  ;;  %3745 = vmatprep.subr.bf16.mxu1 %v3938_v1 }
 0x272   : > { %v2205_v10 = vld [vmem:[#allocation3 + $0x38] sm:$0x11]  ;;  %2879 = vmatprep.mubr.bf16.mxu0 %v3427_v6  ;;  %3724 = vmatpush3.bf16.msra.mxu0 %v3939_v4 }
 0x273   : > { %v3429_v12 = vcombine.high %v2201_v7, %v2205_v10  ;;  %3725 = vmatprep.subr.bf16.mxu0 %v3941_v9  ;;  %v3428_v37 = vcombine.low %v2201_v7, %v2205_v10 }
 0x274   : > { %3746 = vmatpush3.bf16.msra.mxu1 %v3940_v8 }
 0x275   : > { %2919 = vmatprep.mubr.bf16.mxu1 %v3429_v12  ;;  %3747 = vmatprep.subr.bf16.mxu1 %v3942_v11 }
 0x276   : > { %3726 = vmatpush3.bf16.msra.mxu0 %v3943_v13 }
 0x277   : > { %3727 = vmatprep.subr.bf16.mxu0 %v3945_v15 }
 0x278   : > { %3748 = vmatpush3.bf16.msra.mxu1 %v3944_v14 }
 0x279   : > { %3749 = vmatprep.subr.bf16.mxu1 %v3946_v16 }
 0x27a   : > { %3728 = vmatpush3.bf16.msra.mxu0 %v3947_v17 }
 0x27b   : > { %3729 = vmatprep.subr.bf16.mxu0 %v3949_v19 }
 0x27c   : > { %3750 = vmatpush3.bf16.msra.mxu1 %v3948_v18 }
 0x27d   : > { %3751 = vmatprep.subr.bf16.mxu1 %v3950_v22 }
 0x27e   : > { %3730 = vmatpush3.bf16.msra.mxu0 %v3951_v23 }
 0x27f   : > { %3731 = vmatprep.subr.bf16.mxu0 %v3953_v25 }
 0x280   : > { %3752 = vmatpush3.bf16.msra.mxu1 %v3952_v24 }
 0x281   : > { %3753 = vmatprep.subr.bf16.mxu1 %v3954_v26 }
 0x282   : > { %3732 = vmatpush3.bf16.msra.mxu0 %v3955_v27 }
 0x283   : > { %3733 = vmatprep.subr.bf16.mxu0 %v3957_v28 }
 0x284   : > { %3754 = vmatpush3.bf16.msra.mxu1 %v3956_v5 }
 0x285   : > { %3755 = vmatprep.subr.bf16.mxu1 %v3958_v29 }
 0x286   : > { %3734 = vmatpush3.bf16.msra.mxu0 %v3959_v30 }
 0x287   : > { %3735 = vmatprep.subr.bf16.mxu0 %v3961_v33 }
 0x288   : > { %3756 = vmatpush3.bf16.msra.mxu1 %v3960_v32 }
 0x289   : > { %3757 = vmatprep.subr.bf16.mxu1 %v3962_v34 }
 0x28a   : > { %3736 = vmatpush3.bf16.msra.mxu0 %v3963_v35 }
 0x28c   : > { %3758 = vmatpush3.bf16.msra.mxu1 %v3964_v36 }
 0x28d   : > { %2880 = vmatmul.mubr.bf16.vlgmr.msra.gmra.mxu0 %v3426_v20 }
 0x28f   : > { %2920 = vmatmul.mubr.bf16.vlgmr.msra.gmra.mxu1 %v3428_v37 }
 0x32d   : > { %v3693_v38 = vpop.f32.mrf.mxu0 }
 0x32f   : > { %v3715_v39 = vpop.f32.mrf.mxu1  ;;  %v3694_v57 = vpop.f32.mrf.mxu0 }
 0x330   : > { %v3695_v45 = vadd.f32 %v3694_v57, %v3693_v38 }
 0x331   : > { %v3716_v40 = vpop.f32.mrf.mxu1  ;;  %v3696_v52 = vpop.f32.mrf.mxu0 }
 0x332   : > { %v2802_v46 = vadd.f32 %v3695_v45, %v3421_v31  ;;  %v3717_v48 = vadd.f32 %v3716_v40, %v3715_v39 }
 0x333   : > { %v3718_v42 = vpop.f32.mrf.mxu1  ;;  %v3697_v43 = vpop.f32.mrf.mxu0 }
 0x334   : > { %v2842_v21 = vadd.f32 %v3717_v48, %v2802_v46 }
 0x335   : > { %v3719_v44 = vpop.f32.mrf.mxu1 }
 0x34d   : > { %v3737_v47 = vpop.f32.mrf.mxu0 }
 0x34f   : > { %v3759_v50 = vpop.f32.mrf.mxu1  ;;  %v3738_v51 = vpop.f32.mrf.mxu0 }
 0x350   : > { %v3739_v54 = vadd.f32 %v3738_v51, %v3737_v47 }
 0x351   : > { %v3760_v55 = vpop.f32.mrf.mxu1  ;;  %v3740_v53 = vpop.f32.mrf.mxu0 }
 0x352   : > { %v2882_v56 = vadd.f32 %v3739_v54, %v2842_v21  ;;  %v3761_v58 = vadd.f32 %v3760_v55, %v3759_v50 }
 0x353   : > { %v3762_v59 = vpop.f32.mrf.mxu1  ;;  %v3741_v49 = vpop.f32.mrf.mxu0 }
 0x354   : > { %v2922_v60 = vadd.f32 %v3761_v58, %v2882_v56 }
 0x355   : > { %v3763_v61 = vpop.f32.mrf.mxu1 }
 0x356   : > { %v2927_v62 = vmax.f32 %v2922_v60, 0.0 }
 0x358   : > { %v2929_v63 = vrot.slane %v2927_v62, 1  ;;  %v2932_v41 = vrot.slane %v2927_v62, 2  ;;  %v2935_v2 = vrot.slane %v2927_v62, 3 }
 0x35a   : > { %v2931_v0 = vmax.f32 %v2927_v62, %v2929_v63 }
 0x35c   : > { %v2934_v1 = vmax.f32 %v2931_v0, %v2932_v41 }
 0x35e   : > { %v2937_v3 = vmax.f32 %v2934_v1, %v2935_v2 }
 0x360   : > { %2938 = vst [vmem:[%s168_s9] sm:$0x1] %v2937_v3  ;;  %2939 = vst [vmem:[%s168_s9 - $0x3] sm:$0x10] %v2937_v3 }
 0x361 PF: > { %s13_s12 = sadd.s32 1, %s3971_s12  }
 0x362   : > { %p10_p4 = scmp.ge.s32.totalorder %s13_s12, 4  }
 0x364   :  { %12 = sbr.rel (!%p10_p4) target bundleno = 1 (0x1), region = 66 }

</bundles_post_ra>
